<compile_context>
chip_gen: v7x
topology: tpu7x:2x2x1
jax: 0.10.0
libtpu: 0.0.40
codegen_flags: <defaults>
</compile_context>

<pallas_src>
import jax
import jax.numpy as jnp
from jax import lax
from jax.experimental import pallas as pl
from jax.experimental.pallas import tpu as pltpu

HIDDEN = 512
EPS = 1e-12  # torch F.normalize default eps


def ffn_kernel(x_ref, w1_ref, b1_ref, w2_ref, b2_ref, o_ref):
    # fc1 + bias + ReLU (MXU matmul, f32 accumulation; bias-add/ReLU on VPU).
    h = jnp.dot(x_ref[...], w1_ref[...],
                preferred_element_type=jnp.float32,
                precision=lax.Precision.HIGHEST)
    h = jnp.maximum(h + b1_ref[...], 0.0)          # b1 is [1, H], broadcasts

    # fc2 + bias
    y = jnp.dot(h, w2_ref[...],
                preferred_element_type=jnp.float32,
                precision=lax.Precision.HIGHEST)
    y = y + b2_ref[...]                            # b2 is [1, D_out_pad]

    # L2 normalize along the feature axis (torch semantics: y / max(||y||, eps)).
    # Padded output columns are exactly zero, so they do not perturb sumsq.
    sumsq = jnp.sum(y * y, axis=1, keepdims=True)
    inv = lax.rsqrt(jnp.maximum(sumsq, EPS * EPS))  # EUP rsqrt, VPU multiply
    o_ref[...] = (y * inv).astype(o_ref.dtype)


def _round_up(x, m):
    return (x + m - 1) // m * m


def _cdiv(a, b):
    return (a + b - 1) // b


def prepare_params(w1, b1, w2, b2):
    """One-time (init-time) layout prep; keep off the per-call path.

    w1: [d_in, H], b1: [H], w2: [H, d_out], b2: [d_out]  (transposed vs torch).
    Pads the output feature dim of W2/b2 up to a multiple of 128 so the kernel
    stores a lane-dense output slab (unmasked vst); zero columns contribute 0
    to the L2 norm, so semantics are unchanged.
    """
    h_dim, d_out = w2.shape
    d_out_p = _round_up(d_out, 128)
    w2_p = jnp.pad(w2, ((0, 0), (0, d_out_p - d_out)))
    b2_p = jnp.pad(b2.reshape(1, d_out), ((0, 0), (0, d_out_p - d_out)))
    return w1, b1.reshape(1, h_dim), w2_p, b2_p, d_out


def _resident_spec(shape):
    """Grid-invariant operand: VMEM-resident (index_map -> origin), single-buffered."""
    idx = lambda i: (0, 0)
    buffered = getattr(pl, "Buffered", None)
    if buffered is not None:
        try:
            return pl.BlockSpec(shape, idx, pipeline_mode=buffered(1))
        except TypeError:
            pass  # older BlockSpec signature without pipeline_mode
    return pl.BlockSpec(shape, idx)


def _choose_batch_tile(B):
    """~512-row tiles for big B; >=2 tiles for mid-size B (v7x has 2 TCs);
    tile sized from ceil(B / n_tiles) so batch-padding waste stays < 8 rows."""
    if B > 512:
        n_tiles = _cdiv(B, 512)
    elif B >= 256:
        n_tiles = 2
    else:
        n_tiles = 1
    return _round_up(_cdiv(B, n_tiles), 8)


def feed_forward_net(x, w1, b1_2d, w2_p, b2_p, d_out):
    """x: [B, d_in]; params as produced by prepare_params()."""
    B, d_in = x.shape
    h_dim = w1.shape[1]
    d_out_p = w2_p.shape[1]

    tb = _choose_batch_tile(B)
    b_p = _round_up(B, tb)
    xp = x if b_p == B else jnp.pad(x, ((0, b_p - B), (0, 0)))

    grid = (b_p // tb,)

    out = pl.pallas_call(
        ffn_kernel,
        out_shape=jax.ShapeDtypeStruct((b_p, d_out_p), jnp.float32),
        grid=grid,
        in_specs=[
            # Streamed x batch tile: no d_in padding (last dim == full dim).
            pl.BlockSpec((tb, d_in), lambda i: (i, 0)),
            _resident_spec((d_in, h_dim)),     # W1 resident, single-buffered
            _resident_spec((1, h_dim)),        # b1 resident, single-buffered
            _resident_spec((h_dim, d_out_p)),  # W2 resident, single-buffered
            _resident_spec((1, d_out_p)),      # b2 resident, single-buffered
        ],
        out_specs=pl.BlockSpec((tb, d_out_p), lambda i: (i, 0)),
        compiler_params=pltpu.CompilerParams(
            dimension_semantics=("parallel",),
        ),
    )(xp, w1, b1_2d, w2_p, b2_p)

    return out[:B, :d_out]


def reference(x, w1, b1, w2, b2):
    h = jnp.maximum(x @ w1 + b1[None, :], 0.0)
    y = h @ w2 + b2[None, :]
    n = jnp.sqrt(jnp.sum(y * y, axis=1, keepdims=True))
    return y / jnp.maximum(n, EPS)


if __name__ == "__main__":
    key = jax.random.PRNGKey(0)
    B, D_IN, D_OUT = 8, 32, 64

    kx, k1, k2, k3, k4 = jax.random.split(key, 5)
    x = jax.random.normal(kx, (B, D_IN), dtype=jnp.float32)

    # Deterministic Kaiming-uniform-like init (shapes match nn.Linear, stored
    # transposed): fc1.weight [512, D_IN] -> [D_IN, 512]; fc1.bias [512].
    lim1 = 1.0 / (D_IN ** 0.5)
    w1 = jax.random.uniform(k1, (D_IN, HIDDEN), minval=-lim1, maxval=lim1,
                            dtype=jnp.float32)
    b1 = jax.random.uniform(k2, (HIDDEN,), minval=-lim1, maxval=lim1,
                            dtype=jnp.float32)
    # fc2.weight [D_OUT, 512] -> [512, D_OUT]; fc2.bias [D_OUT].
    lim2 = 1.0 / (HIDDEN ** 0.5)
    w2 = jax.random.uniform(k3, (HIDDEN, D_OUT), minval=-lim2, maxval=lim2,
                            dtype=jnp.float32)
    b2 = jax.random.uniform(k4, (D_OUT,), minval=-lim2, maxval=lim2,
                            dtype=jnp.float32)

    # One-time parameter layout prep (kept out of the per-call path).
    w1_r, b1_r, w2_r, b2_r, d_out = prepare_params(w1, b1, w2, b2)

    out = feed_forward_net(x, w1_r, b1_r, w2_r, b2_r, d_out)
    out = jax.block_until_ready(out)

    ref = reference(x, w1, b1, w2, b2)
    assert out.shape == (B, D_OUT)
    assert jnp.allclose(out, ref, atol=1e-5, rtol=1e-5)

    print("KERNEL_OK")
</pallas_src>

<mosaic_0001>
module attributes {stable_mosaic.version = 11 : i64} {
  func.func @ffn_kernel(%arg0: i32, %arg1: memref<8x32xf32, #tpu.memory_space<vmem>>, %arg2: memref<32x512xf32, #tpu.memory_space<vmem>>, %arg3: memref<1x512xf32, #tpu.memory_space<vmem>>, %arg4: memref<512x128xf32, #tpu.memory_space<vmem>>, %arg5: memref<1x128xf32, #tpu.memory_space<vmem>>, %arg6: memref<8x128xf32, #tpu.memory_space<vmem>>) attributes {dimension_semantics = [#tpu.dimension_semantics<parallel>], iteration_bounds = array<i64: 1>, scalar_prefetch = 0 : i64, scratch_operands = 0 : i64, tpu.core_type = #tpu.core_type<tc>, window_params = [{transform_indices = @transform_0, window_bounds = array<i64: 8, 32>}, {pipeline_mode = #tpu.pipeline_mode<synchronous>, transform_indices = @transform_1, window_bounds = array<i64: 32, 512>}, {pipeline_mode = #tpu.pipeline_mode<synchronous>, transform_indices = @transform_2, window_bounds = array<i64: 1, 512>}, {pipeline_mode = #tpu.pipeline_mode<synchronous>, transform_indices = @transform_3, window_bounds = array<i64: 512, 128>}, {pipeline_mode = #tpu.pipeline_mode<synchronous>, transform_indices = @transform_4, window_bounds = array<i64: 1, 128>}, {transform_indices = @transform_5, window_bounds = array<i64: 8, 128>}]} {
    %c0 = arith.constant 0 : index
    %c0_0 = arith.constant 0 : index
    %0 = vector.load %arg1[%c0, %c0_0] : memref<8x32xf32, #tpu.memory_space<vmem>>, vector<8x32xf32>
    %c0_1 = arith.constant 0 : index
    %c0_2 = arith.constant 0 : index
    %1 = vector.load %arg2[%c0_1, %c0_2] : memref<32x512xf32, #tpu.memory_space<vmem>>, vector<32x512xf32>
    %cst = arith.constant dense<0.000000e+00> : vector<8x512xf32>
    %2 = tpu.matmul %0, %1, %cst {dimension_numbers = #tpu.dot_dimension_numbers<[1], [0], [0], [1], [0, 0, 1, 1], [], []>, precision = #tpu.contract_precision<fp32>} : vector<8x32xf32>, vector<32x512xf32>, vector<8x512xf32> -> vector<8x512xf32>
    %c0_3 = arith.constant 0 : index
    %c0_4 = arith.constant 0 : index
    %3 = vector.load %arg3[%c0_3, %c0_4] : memref<1x512xf32, #tpu.memory_space<vmem>>, vector<1x512xf32>
    %4 = vector.broadcast %3 : vector<1x512xf32> to vector<8x512xf32>
    %5 = arith.addf %2, %4 : vector<8x512xf32>
    %cst_5 = arith.constant 0.000000e+00 : f32
    %6 = vector.broadcast %cst_5 : f32 to vector<8x512xf32>
    %7 = arith.maximumf %5, %6 : vector<8x512xf32>
    %c0_6 = arith.constant 0 : index
    %c0_7 = arith.constant 0 : index
    %8 = vector.load %arg4[%c0_6, %c0_7] : memref<512x128xf32, #tpu.memory_space<vmem>>, vector<512x128xf32>
    %cst_8 = arith.constant dense<0.000000e+00> : vector<8x128xf32>
    %9 = tpu.matmul %7, %8, %cst_8 {dimension_numbers = #tpu.dot_dimension_numbers<[1], [0], [0], [1], [0, 0, 1, 1], [], []>, precision = #tpu.contract_precision<fp32>} : vector<8x512xf32>, vector<512x128xf32>, vector<8x128xf32> -> vector<8x128xf32>
    %c0_9 = arith.constant 0 : index
    %c0_10 = arith.constant 0 : index
    %10 = vector.load %arg5[%c0_9, %c0_10] : memref<1x128xf32, #tpu.memory_space<vmem>>, vector<1x128xf32>
    %11 = vector.broadcast %10 : vector<1x128xf32> to vector<8x128xf32>
    %12 = arith.addf %9, %11 : vector<8x128xf32>
    %13 = arith.mulf %12, %12 : vector<8x128xf32>
    %cst_11 = arith.constant dense<0.000000e+00> : vector<8xf32>
    %14 = vector.multi_reduction <add>, %13, %cst_11 [1] : vector<8x128xf32> to vector<8xf32>
    %15 = vector.shape_cast %14 : vector<8xf32> to vector<8x1xf32>
    %cst_12 = arith.constant 1.000000e-24 : f32
    %16 = vector.broadcast %cst_12 : f32 to vector<8x1xf32>
    %17 = arith.maximumf %15, %16 : vector<8x1xf32>
    %18 = math.rsqrt %17 : vector<8x1xf32>
    %19 = vector.broadcast %18 : vector<8x1xf32> to vector<8x128xf32>
    %20 = arith.mulf %12, %19 : vector<8x128xf32>
    %c0_13 = arith.constant 0 : index
    %c0_14 = arith.constant 0 : index
    %21 = vector.load %arg6[%c0_13, %c0_14] : memref<8x128xf32, #tpu.memory_space<vmem>>, vector<8x128xf32>
    tpu.vector_store %arg6[%c0_13, %c0_14], %20 {strides = array<i32>} : memref<8x128xf32, #tpu.memory_space<vmem>>, vector<8x128xf32>,
    return
  }
  func.func @transform_0(%arg0: i32) -> (i32, i32) {
    %c0_i32 = arith.constant 0 : i32
    %c0_i32_0 = arith.constant 0 : i32
    return %arg0, %c0_i32 : i32, i32
  }
  func.func @transform_1(%arg0: i32) -> (i32, i32) {
    %c0_i32 = arith.constant 0 : i32
    %c0_i32_0 = arith.constant 0 : i32
    %c0_i32_1 = arith.constant 0 : i32
    return %c0_i32, %c0_i32_0 : i32, i32
  }
  func.func @transform_2(%arg0: i32) -> (i32, i32) {
    %c0_i32 = arith.constant 0 : i32
    %c0_i32_0 = arith.constant 0 : i32
    %c0_i32_1 = arith.constant 0 : i32
    return %c0_i32, %c0_i32_0 : i32, i32
  }
  func.func @transform_3(%arg0: i32) -> (i32, i32) {
    %c0_i32 = arith.constant 0 : i32
    %c0_i32_0 = arith.constant 0 : i32
    %c0_i32_1 = arith.constant 0 : i32
    return %c0_i32, %c0_i32_0 : i32, i32
  }
  func.func @transform_4(%arg0: i32) -> (i32, i32) {
    %c0_i32 = arith.constant 0 : i32
    %c0_i32_0 = arith.constant 0 : i32
    %c0_i32_1 = arith.constant 0 : i32
    return %c0_i32, %c0_i32_0 : i32, i32
  }
  func.func @transform_5(%arg0: i32) -> (i32, i32) {
    %c0_i32 = arith.constant 0 : i32
    %c0_i32_0 = arith.constant 0 : i32
    return %arg0, %c0_i32 : i32, i32
  }
}

</mosaic_0001>

<bundles_post_ra>
// kernel: tpu_custom_call.1
= control target key start
LH: loop header
LB: loop body
LE: loop exit
PB: predicated region body
PF: predicated region fallthrough
CT: control target
= control target key end

     0   :  { %10 = vsyncpa [#allocation3], 0  ;;  %s5647_s0 = inlined_call_operand.hbm [shape: f32[8,32], index: 0, kind: input, shape index: {}]   ;;  %s5648_s1 = inlined_call_operand.hbm [shape: f32[32,512], index: 1, kind: input, shape index: {}]   ;;  %s5649_s2 = inlined_call_operand.vmem [shape: f32[1,512], index: 2, kind: input, shape index: {}]   ;;  %s5650_s3 = inlined_call_operand.hbm [shape: f32[512,128], index: 3, kind: input, shape index: {}]   ;;  %s5651_s4 = inlined_call_operand.vmem [shape: f32[1,128], index: 4, kind: input, shape index: {}]   ;;  %s5652_s5 = inlined_call_operand.hbm [shape: f32[8,128], index: 5, kind: output, shape index: {}]  }
   0x1   :  { %11 = vsyncpa [#allocation6], 0 }
   0x2   :  { %12 = vsyncpa [#allocation4], 0  ;;  %s4041_s18 = smov [#allocation5]   ;;  %s3947_s22 = scalar_lea.hbm %s5648_s1, 2048 }
   0x3   :  { %s28_s19 = sshll.u32 %s4041_s18, 4  ;;  %p3948_p0 = scmp.ne.s32.totalorder %s5648_s1, %s3947_s22  ;;  %s29_s19 = int_to_ptr.vmem [resolvable:$true] %s28_s19 }
   0x4   :  { %p3951_p1 = scmp.lt.u32.totalorder %s3947_s22, %s5648_s1 }
   0x6   :  { %p3953_p2 = pnand %p3951_p1, %p3948_p0 }
   0x8   :  { %3956 = shalt.err (!%p3953_p2)
}
   0x9   :  { %s3957_s27 = scalar_lea.vmem %s29_s19, 2048  ;;  %p3962_p4 = scmp.lt.s32.totalorder %s29_s19, %s29_s19 }
   0xa   :  { %p3958_p3 = scmp.ne.s32.totalorder %s29_s19, %s3957_s27  ;;  %p3963_p5 = scmp.lt.s32.totalorder %s3957_s27, %s3957_s27 }
   0xc   :  { %p3964_p6 = por %p3963_p5, %p3962_p4 }
   0xe   :  { %p3965_p7 = pnand %p3964_p6, %p3958_p3 }
  0x10   :  { %3968 = shalt.err (!%p3965_p7)
}
  0x11   :  { %s4042_s28 = smov 512   ;;  %s4043_s29 = smov 32  }
  0x12   :  { %34 = dma.hbm_to_vmem [thread:$0]  %s5648_s1, 2048, %s29_s19, [#allocation6], %s4042_s28, %s4042_s28, %s4043_s29  }
  0x13   :  { %s4044_s7 = smov [#allocation2]   ;;  %s4045_s9 = smov [#allocation7]  }
  0x14   :  { %s19_s8 = sshll.u32 %s4044_s7, 4  ;;  %s42_s10 = sshll.u32 %s4045_s9, 4  ;;  %s20_s8 = int_to_ptr.vmem [resolvable:$true] %s19_s8  ;;  %s43_s10 = int_to_ptr.vmem [resolvable:$true] %s42_s10 }
  0x15   :  { %s3969_s13 = scalar_lea.hbm %s5647_s0, 128 }
  0x16   :  { %p3970_p8 = scmp.ne.s32.totalorder %s5647_s0, %s3969_s13  ;;  %p3973_p9 = scmp.lt.u32.totalorder %s3969_s13, %s5647_s0 }
  0x18   :  { %p3975_p10 = pnand %p3973_p9, %p3970_p8 }
  0x1a   :  { %3978 = shalt.err (!%p3975_p10)
}
  0x1b   :  { %s3979_s1 = scalar_lea.vmem %s20_s8, 128  ;;  %p3984_p12 = scmp.lt.s32.totalorder %s20_s8, %s20_s8 }
  0x1c   :  { %p3980_p11 = scmp.ne.s32.totalorder %s20_s8, %s3979_s1  ;;  %p3985_p13 = scmp.lt.s32.totalorder %s3979_s1, %s3979_s1 }
  0x1e   :  { %p3986_p0 = por %p3985_p13, %p3984_p12 }
  0x20   :  { %p3987_p1 = pnand %p3986_p0, %p3980_p11 }
  0x22   :  { %3990 = shalt.err (!%p3987_p1)
}
  0x23   :  { %22 = dma.hbm_to_vmem [thread:$0]  %s5647_s0, 128, %s20_s8, [#allocation3]  }
  0x24   :  { %s3991_s22 = scalar_lea.hbm %s5650_s3, 8192 }
  0x25   :  { %p3992_p2 = scmp.ne.s32.totalorder %s5650_s3, %s3991_s22  ;;  %p3995_p3 = scmp.lt.u32.totalorder %s3991_s22, %s5650_s3 }
  0x27   :  { %p3997_p4 = pnand %p3995_p3, %p3992_p2 }
  0x29   :  { %4000 = shalt.err (!%p3997_p4)
}
  0x2a   :  { %s4001_s27 = scalar_lea.vmem %s43_s10, 8192  ;;  %p4006_p6 = scmp.lt.s32.totalorder %s43_s10, %s43_s10 }
  0x2b   :  { %p4002_p5 = scmp.ne.s32.totalorder %s43_s10, %s4001_s27  ;;  %p4007_p7 = scmp.lt.s32.totalorder %s4001_s27, %s4001_s27 }
  0x2d   :  { %p4008_p8 = por %p4007_p7, %p4006_p6 }
  0x2f   :  { %p4009_p9 = pnand %p4008_p8, %p4002_p5 }
  0x31   :  { %4012 = shalt.err (!%p4009_p9)
}
  0x32   :  { %s4046_s0 = smov 128   ;;  %s4047_s28 = smov 8  }
  0x33   :  { %48 = dma.hbm_to_vmem [thread:$0]  %s5650_s3, 8192, %s43_s10, [#allocation6], %s4046_s0, %s4046_s0, %s4047_s28  }
  0x34   :  { %4035 = dma.done.wait [#allocation3], 128  }
  0x35   :  { %4036 = vsyncadd [#allocation3], 4294967168 }
  0x36   :  { %4037 = dma.done.wait [#allocation6], 10240  }
  0x37   :  { %4038 = vsyncadd [#allocation6], 4294957056  ;;  %v4048_v0 = vmov 0.0   ;;  %v62_v1 = vld [vmem:[#allocation5 + $0x8] sm:$0xff]  ;;  %v61_v3 = vld [vmem:[#allocation5] sm:$0xff]  ;;  %vm99_vm0 = vcmask 261120  }
  0x38   :  { %175 = vmatprep.mubr.f32.mxu0 %v4048_v0  ;;  %718 = vmatprep.mubr.f32.mxu1 %v4048_v0  ;;  %v66_v2 = vld [vmem:[#allocation5 + $0x28] sm:$0xff]  ;;  %v103_v4 = vand.u32 4294901760, %v62_v1  ;;  %v65_v6 = vld [vmem:[#allocation5 + $0x20] sm:$0xff]  ;;  %v105_v7 = vand.u32 4294901760, %v61_v3  ;;  %v60_v15 = vld [vmem:[#allocation2] sm:$0xff] }
  0x39   :  { %v107_v5 = vand.u32 4294901760, %v66_v2  ;;  %v70_v8 = vld [vmem:[#allocation5 + $0x48] sm:$0xff]  ;;  %v109_v10 = vand.u32 4294901760, %v65_v6  ;;  %v69_v13 = vld [vmem:[#allocation5 + $0x40] sm:$0xff]  ;;  %v101_v27 = vsel %vm99_vm0, %v60_v15, 0  ;;  %v64_v58 = vld [vmem:[#allocation5 + $0x18] sm:$0xff] }
  0x3a   :  { %v74_v9 = vld [vmem:[#allocation5 + $0x68] sm:$0xff]  ;;  %v111_v11 = vand.u32 4294901760, %v70_v8  ;;  %v73_v14 = vld [vmem:[#allocation5 + $0x60] sm:$0xff]  ;;  %v4120_v17 = vsub.f32 %v62_v1, %v103_v4  ;;  %v4124_v19 = vsub.f32 %v61_v3, %v105_v7  ;;  %v113_v25 = vand.u32 4294901760, %v69_v13  ;;  %v68_v59 = vld [vmem:[#allocation5 + $0x38] sm:$0xff] }
  0x3b   :  { %v115_v12 = vand.u32 4294901760, %v74_v9  ;;  %v4118_v16 = vpack.c.bf16 %v107_v5, %v103_v4  ;;  %v4122_v18 = vsub.f32 %v66_v2, %v107_v5  ;;  %v4126_v20 = vpack.c.bf16 %v109_v10, %v105_v7  ;;  %v63_v63 = vld [vmem:[#allocation5 + $0x10] sm:$0xff]  ;;  %v72_v2 = vld [vmem:[#allocation5 + $0x58] sm:$0xff] }
  0x3c   :  { %v4128_v21 = vsub.f32 %v65_v6, %v109_v10  ;;  %v4132_v23 = vsub.f32 %v70_v8, %v111_v11  ;;  %v117_v26 = vand.u32 4294901760, %v73_v14  ;;  %v4139_v28 = vand.u32 4294901760, %v101_v27  ;;  %v67_v1 = vld [vmem:[#allocation5 + $0x30] sm:$0xff]  ;;  %v76_v6 = vld [vmem:[#allocation5 + $0x78] sm:$0xff] }
  0x3d   :  { %v4130_v22 = vpack.c.bf16 %v115_v12, %v111_v11  ;;  %3433 = vmatprep.subr.bf16.mxu0 %v4118_v16  ;;  %v4135_v24 = vsub.f32 %v74_v9, %v115_v12  ;;  %v189_v29 = vand.u32 4294901760, %v4120_v17  ;;  %v201_v30 = vand.u32 4294901760, %v4122_v18  ;;  %v71_v7 = vld [vmem:[#allocation5 + $0x50] sm:$0xff] }
  0x3e   :  { %3435 = vmatpush1.bf16.msra.mxu0 %v4126_v20  ;;  %v195_v31 = vand.u32 4294901760, %v4124_v19  ;;  %v4145_v32 = vpack.c.bf16 %v117_v26, %v113_v25  ;;  %v4147_v33 = vsub.f32 %v69_v13, %v113_v25  ;;  %v4149_v34 = vsub.f32 %v73_v14, %v117_v26 }
  0x3f   :  { %3437 = vmatprep.subr.bf16.mxu0 %v4130_v22  ;;  %v207_v35 = vand.u32 4294901760, %v4128_v21  ;;  %v4153_v36 = vsub.f32 %v101_v27, %v4139_v28  ;;  %v190_v37 = vsub.f32 %v4120_v17, %v189_v29  ;;  %v202_v38 = vsub.f32 %v4122_v18, %v201_v30 }
  0x40   :  { %v196_v39 = vsub.f32 %v4124_v19, %v195_v31  ;;  %v213_v41 = vand.u32 4294901760, %v4132_v23  ;;  %v225_v42 = vand.u32 4294901760, %v4135_v24  ;;  %v219_v43 = vand.u32 4294901760, %v4147_v33 }
  0x41   :  { %v208_v40 = vsub.f32 %v4128_v21, %v207_v35  ;;  %v4172_v44 = vand.u32 4294901760, %v4153_v36  ;;  %v191_v45 = vand.u32 4294901760, %v190_v37  ;;  %v203_v46 = vand.u32 4294901760, %v202_v38  ;;  %v75_v37 = vld [vmem:[#allocation5 + $0x70] sm:$0xff] }
  0x42   :  { %3439 = vmatpush1.bf16.msra.mxu0 %v4145_v32  ;;  %v197_v47 = vand.u32 4294901760, %v196_v39  ;;  %v214_v49 = vsub.f32 %v4132_v23, %v213_v41  ;;  %v226_v50 = vsub.f32 %v4135_v24, %v225_v42  ;;  %v220_v51 = vsub.f32 %v4147_v33, %v219_v43 }
  0x43   :  { %v209_v48 = vand.u32 4294901760, %v208_v40  ;;  %v179_v52 = vsub.f32 %v4153_v36, %v4172_v44  ;;  %v3440_v53 = vpack.c.bf16 %v203_v46, %v191_v45  ;;  %v231_v54 = vand.u32 4294901760, %v4149_v34 }
  0x44   :  { %v215_v56 = vand.u32 4294901760, %v214_v49  ;;  %v227_v57 = vand.u32 4294901760, %v226_v50  ;;  %v221_v61 = vand.u32 4294901760, %v220_v51  ;;  %v3448_v4 = vpack.c.bf16 %v4122_v18, %v4120_v17 }
  0x45   :  { %v3442_v55 = vpack.c.bf16 %v209_v48, %v197_v47  ;;  %v4186_v60 = vand.u32 4294901760, %v179_v52  ;;  %3441 = vmatprep.subr.bf16.mxu0 %v3440_v53  ;;  %v232_v62 = vsub.f32 %v4149_v34, %v231_v54  ;;  %v3450_v5 = vpack.c.bf16 %v4128_v21, %v4124_v19 }
  0x46   :  { %v3444_v3 = vpack.c.bf16 %v227_v57, %v215_v56  ;;  %v3452_v9 = vpack.c.bf16 %v4135_v24, %v4132_v23  ;;  %v3454_v10 = vpack.c.bf16 %v4149_v34, %v4147_v33  ;;  %v646_v11 = vand.u32 4294901760, %v64_v58 }
  0x47   :  { %181 = vmatmul.mubr.f32.vlgmr.msra.gmra.mrb[0].mxu0 %v4186_v60  ;;  %v233_v8 = vand.u32 4294901760, %v232_v62  ;;  %v650_v12 = vand.u32 4294901760, %v68_v59  ;;  %v648_v13 = vand.u32 4294901760, %v63_v63  ;;  %v652_v14 = vand.u32 4294901760, %v67_v1 }
  0x48   :  { %3443 = vmatpush1.bf16.msra.mxu0 %v3442_v55  ;;  %291 = vmatprep.mubr.f32.mxu0 %v4048_v0  ;;  %v654_v15 = vand.u32 4294901760, %v72_v2  ;;  %v4201_v26 = vsub.f32 %v64_v58, %v646_v11  ;;  %v658_v27 = vand.u32 4294901760, %v76_v6  ;;  %v656_v38 = vand.u32 4294901760, %v71_v7 }
  0x49   :  { %3445 = vmatprep.subr.bf16.mxu0 %v3444_v3  ;;  %v3446_v25 = vpack.c.bf16 %v233_v8, %v221_v61  ;;  %v4203_v39 = vpack.c.bf16 %v650_v12, %v646_v11  ;;  %v4205_v40 = vsub.f32 %v68_v59, %v650_v12  ;;  %v4207_v45 = vpack.c.bf16 %v652_v14, %v648_v13 }
  0x4a   :  { %v4209_v46 = vsub.f32 %v63_v63, %v648_v13  ;;  %v4211_v47 = vsub.f32 %v67_v1, %v652_v14  ;;  %v4213_v48 = vpack.c.bf16 %v658_v27, %v654_v15  ;;  %v4215_v49 = vsub.f32 %v72_v2, %v654_v15 }
  0x4b   :  { %v4217_v50 = vsub.f32 %v76_v6, %v658_v27  ;;  %3481 = vmatprep.subr.bf16.mxu1 %v4203_v39  ;;  %v660_v51 = vand.u32 4294901760, %v75_v37  ;;  %v4220_v52 = vsub.f32 %v71_v7, %v656_v38  ;;  %v732_v53 = vand.u32 4294901760, %v4201_v26 }
  0x4c   :  { %3447 = vmatpush1.bf16.msra.mxu0 %v3446_v25  ;;  %v744_v55 = vand.u32 4294901760, %v4205_v40  ;;  %3483 = vmatpush1.bf16.msra.mxu1 %v4207_v45  ;;  %v738_v56 = vand.u32 4294901760, %v4209_v46  ;;  %v750_v57 = vand.u32 4294901760, %v4211_v47  ;;  %v756_v58 = vand.u32 4294901760, %v4215_v49 }
  0x4d   :  { %3449 = vmatprep.subr.bf16.mxu0 %v3448_v4  ;;  %v768_v59 = vand.u32 4294901760, %v4217_v50  ;;  %3485 = vmatprep.subr.bf16.mxu1 %v4213_v48  ;;  %v4230_v61 = vpack.c.bf16 %v660_v51, %v656_v38  ;;  %v4232_v62 = vsub.f32 %v75_v37, %v660_v51  ;;  %v733_v63 = vsub.f32 %v4201_v26, %v732_v53 }
  0x4e   :  { %v745_v1 = vsub.f32 %v4205_v40, %v744_v55  ;;  %v739_v2 = vsub.f32 %v4209_v46, %v738_v56  ;;  %v751_v3 = vsub.f32 %v4211_v47, %v750_v57  ;;  %v757_v4 = vsub.f32 %v4215_v49, %v756_v58 }
  0x4f   :  { %293 = vmatmul.mubr.f32.vlgmr.msra.gmra.mrb[0].mxu0 %v4139_v28  ;;  %v769_v6 = vsub.f32 %v4217_v50, %v768_v59  ;;  %v734_v7 = vand.u32 4294901760, %v733_v63  ;;  %v762_v11 = vand.u32 4294901760, %v4220_v52  ;;  %v774_v12 = vand.u32 4294901760, %v4232_v62 }
  0x50   :  { %3451 = vmatpush1.bf16.msra.mxu0 %v3450_v5  ;;  %379 = vmatprep.mubr.f32.mxu0 %v4048_v0  ;;  %v746_v8 = vand.u32 4294901760, %v745_v1  ;;  %v740_v13 = vand.u32 4294901760, %v739_v2  ;;  %v752_v14 = vand.u32 4294901760, %v751_v3  ;;  %v758_v15 = vand.u32 4294901760, %v757_v4 }
  0x51   :  { %3453 = vmatprep.subr.bf16.mxu0 %v3452_v9  ;;  %3487 = vmatpush1.bf16.msra.mxu1 %v4230_v61  ;;  %v770_v25 = vand.u32 4294901760, %v769_v6  ;;  %v763_v5 = vsub.f32 %v4220_v52, %v762_v11  ;;  %v775_v37 = vsub.f32 %v4232_v62, %v774_v12  ;;  %v3496_v2 = vpack.c.bf16 %v4205_v40, %v4201_v26  ;;  %v4282_v6 = vld [vmem:[#allocation7 + $0x88] sm:$0xff] }
  0x52   :  { %v3488_v27 = vpack.c.bf16 %v746_v8, %v734_v7  ;;  %v3490_v38 = vpack.c.bf16 %v752_v14, %v740_v13  ;;  %v3498_v3 = vpack.c.bf16 %v4211_v47, %v4209_v46  ;;  %v3500_v4 = vpack.c.bf16 %v4217_v50, %v4215_v49  ;;  %v4284_v7 = vld [vmem:[#allocation7] sm:$0xff]  ;;  %v4286_v8 = vld [vmem:[#allocation7 + $0x8] sm:$0xff]  ;;  %v4309_v14 = vld [vmem:[#allocation7 + $0x10] sm:$0xff] }
  0x53   :  { %v3492_v51 = vpack.c.bf16 %v770_v25, %v758_v15  ;;  %v764_v9 = vand.u32 4294901760, %v763_v5  ;;  %v776_v63 = vand.u32 4294901760, %v775_v37  ;;  %v3466_v17 = vpack.c.bf16 %v207_v35, %v195_v31  ;;  %v4322_v15 = vld [vmem:[#allocation7 + $0x18] sm:$0xff] }
  0x54   :  { %3455 = vmatpush1.bf16.msra.mxu0 %v3454_v10  ;;  %724 = vmatmul.mubr.f32.vlgmr.msra.gmra.mrb[0].mxu1 %v4186_v60  ;;  %v3464_v60 = vpack.c.bf16 %v201_v30, %v189_v29  ;;  %v4276_v10 = vld [vmem:[#allocation7 + $0x80] sm:$0xff]  ;;  %v4294_v29 = vld [vmem:[#allocation7 + $0x90] sm:$0xff]  ;;  %v4296_v30 = vld [vmem:[#allocation7 + $0x98] sm:$0xff]  ;;  %v3468_v13 = vpack.c.bf16 %v225_v42, %v213_v41  ;;  %v3502_v19 = vpack.c.bf16 %v4232_v62, %v4220_v52  ;;  %v1316_v21 = vand.u32 4294901760, %v4282_v6 }
  0x55   :  { %3457 = vmatprep.subr.bf16.mxu0 %v4118_v16  ;;  %3489 = vmatprep.subr.bf16.mxu1 %v3488_v27  ;;  %v3494_v1 = vpack.c.bf16 %v776_v63, %v764_v9  ;;  %v1313_v18 = vand.u32 4294901760, %v4276_v10  ;;  %v1265_v31 = vand.u32 4294901760, %v4284_v7  ;;  %v1268_v35 = vand.u32 4294901760, %v4286_v8  ;;  %v4360_v9 = vld [vmem:[#allocation7 + $0xa8] sm:$0xff] }
  0x56   :  { %3491 = vmatpush1.bf16.msra.mxu1 %v3490_v38  ;;  %834 = vmatprep.mubr.f32.mxu1 %v4048_v0  ;;  %v1319_v23 = vand.u32 4294901760, %v4294_v29  ;;  %v1322_v24 = vand.u32 4294901760, %v4296_v30  ;;  %v3470_v41 = vpack.c.bf16 %v231_v54, %v219_v43  ;;  %v1271_v25 = vand.u32 4294901760, %v4309_v14  ;;  %v4351_v38 = vld [vmem:[#allocation7 + $0xa0] sm:$0xff] }
  0x57   :  { %382 = vmatmul.mubr.f32.vlgmr.msra.gmra.mrb[0].mxu0 %v4153_v36  ;;  %3493 = vmatprep.subr.bf16.mxu1 %v3492_v51  ;;  %v4320_v42 = vsub.f32 %v4276_v10, %v1313_v18  ;;  %v4326_v27 = vsub.f32 %v4282_v6, %v1316_v21  ;;  %v4331_v33 = vsub.f32 %v4284_v7, %v1265_v31  ;;  %v1274_v5 = vand.u32 4294901760, %v4322_v15 }
  0x58   :  { %3459 = vmatpush1.bf16.msra.mxu0 %v4126_v20  ;;  %460 = vmatprep.mubr.f32.mxu0 %v4048_v0  ;;  %v4336_v34 = vsub.f32 %v4286_v8, %v1268_v35  ;;  %v4342_v43 = vsub.f32 %v4294_v29, %v1319_v23  ;;  %v4347_v54 = vsub.f32 %v4296_v30, %v1322_v24  ;;  %v1325_v40 = vand.u32 4294901760, %v4351_v38  ;;  %v1200_v29 = vld [vmem:[#allocation7 + $0x38] sm:$0xff] }
  0x59   :  { %3461 = vmatprep.subr.bf16.mxu0 %v4130_v22  ;;  %v5666_v37 = vand.u32 4294901760, %v4320_v42  ;;  %v4358_v51 = vsub.f32 %v4309_v14, %v1271_v25  ;;  %v3512_v63 = vpack.c.bf16 %v744_v55, %v732_v53  ;;  %v4378_v26 = vsub.f32 %v4322_v15, %v1274_v5  ;;  %v4381_v53 = vld [vmem:[#allocation7 + $0x20] sm:$0xff] }
  0x5a   :  { %3495 = vmatpush1.bf16.msra.mxu1 %v3494_v1  ;;  %v5660_v1 = vand.u32 4294901760, %v4336_v34  ;;  %v3514_v55 = vpack.c.bf16 %v750_v57, %v738_v56  ;;  %v3518_v46 = vpack.c.bf16 %v774_v12, %v762_v11  ;;  %v4403_v56 = vpack.c.bf16 %v1316_v21, %v1313_v18  ;;  %v4405_v57 = vld [vmem:[#allocation7 + $0x28] sm:$0xff]  ;;  %v4462_v21 = vld [vmem:[#allocation7 + $0x30] sm:$0xff] }
  0x5b   :  { %3497 = vmatprep.subr.bf16.mxu1 %v3496_v2  ;;  %v5659_v2 = vand.u32 4294901760, %v4342_v43  ;;  %v1492_v10 = vsub.f32 %v4320_v42, %v5666_v37  ;;  %v5657_v47 = vand.u32 4294901760, %v4358_v51  ;;  %v1277_v52 = vand.u32 4294901760, %v4381_v53 }
  0x5c   :  { %3463 = vmatpush1.bf16.msra.mxu0 %v4145_v32  ;;  %v1387_v50 = vsub.f32 %v4336_v34, %v5660_v1  ;;  %v5655_v12 = vand.u32 4294901760, %v4378_v26  ;;  %v4444_v18 = vpack.c.bf16 %v1268_v35, %v1265_v31 }
  0x5d   :  { %3465 = vmatprep.subr.bf16.mxu0 %v3464_v60  ;;  %836 = vmatmul.mubr.f32.vlgmr.msra.gmra.mrb[0].mxu1 %v4139_v28  ;;  %v5658_v60 = vand.u32 4294901760, %v4347_v54  ;;  %v4425_v62 = vsub.f32 %v4342_v43, %v5659_v2  ;;  %v1493_v6 = vand.u32 4294901760, %v1492_v10  ;;  %v4489_v10 = vld [vmem:[#allocation7 + $0xc0] sm:$0xff] }
  0x5e   :  { %3499 = vmatpush1.bf16.msra.mxu1 %v3498_v3  ;;  %922 = vmatprep.mubr.f32.mxu1 %v4048_v0  ;;  %v1328_v3 = vand.u32 4294901760, %v4360_v9  ;;  %v1388_v35 = vand.u32 4294901760, %v1387_v50 }
  0x5f   :  { %464 = vmatmul.mubr.f32.vlgmr.msra.gmra.mrb[0].mxu0 %v4172_v44  ;;  %3501 = vmatprep.subr.bf16.mxu1 %v3500_v4  ;;  %v4430_v11 = vsub.f32 %v4347_v54, %v5658_v60  ;;  %v4434_v4 = vsub.f32 %v4351_v38, %v1325_v40  ;;  %v1507_v30 = vand.u32 4294901760, %v4425_v62 }
  0x60   :  { %3467 = vmatpush1.bf16.msra.mxu0 %v3466_v17  ;;  %558 = vmatprep.mubr.f32.mxu0 %v4048_v0  ;;  %v4438_v17 = vsub.f32 %v4360_v9, %v1328_v3  ;;  %v4500_v14 = vpack.c.bf16 %v1328_v3, %v1325_v40  ;;  %v4513_v3 = vld [vmem:[#allocation7 + $0x40] sm:$0xff] }
  0x61   :  { %3469 = vmatprep.subr.bf16.mxu0 %v3468_v13  ;;  %v1280_v13 = vand.u32 4294901760, %v4405_v57  ;;  %v5654_v38 = vand.u32 4294901760, %v4434_v4 }
  0x62   :  { %3503 = vmatpush1.bf16.msra.mxu1 %v3502_v19  ;;  %v4451_v19 = vsub.f32 %v4358_v51, %v5657_v47  ;;  %v5653_v9 = vand.u32 4294901760, %v4438_v17 }
  0x63   :  { %3505 = vmatprep.subr.bf16.mxu1 %v4203_v39 }
  0x64   :  { %3471 = vmatpush1.bf16.msra.mxu0 %v3470_v41  ;;  %v4466_v41 = vsub.f32 %v4381_v53, %v1277_v52  ;;  %v4486_v53 = vpack.c.bf16 %v1274_v5, %v1271_v25  ;;  %v1395_v5 = vand.u32 4294901760, %v4451_v19  ;;  %v4525_v19 = vpack.c.bf16 %v1280_v13, %v1277_v52 }
  0x65   :  { %3473 = vmatprep.subr.bf16.mxu0 %v4118_v16  ;;  %925 = vmatmul.mubr.f32.vlgmr.msra.gmra.mrb[0].mxu1 %v4153_v36  ;;  %v5665_v16 = vand.u32 4294901760, %v4326_v27  ;;  %v5664_v36 = vand.u32 4294901760, %v4331_v33 }
  0x66   :  { %3507 = vmatpush1.bf16.msra.mxu1 %v4207_v45  ;;  %1003 = vmatprep.mubr.f32.mxu1 %v4048_v0  ;;  %v5656_v50 = vand.u32 4294901760, %v4466_v41 }
  0x67   :  { %560 = vmatmul.mubr.f32.vlgmr.msra.gmra.mrb[0].mxu0 %v4139_v28  ;;  %3509 = vmatprep.subr.bf16.mxu1 %v4213_v48  ;;  %v1380_v49 = vsub.f32 %v4331_v33, %v5664_v36 }
  0x68   :  { %3475 = vmatpush1.bf16.msra.mxu0 %v4126_v20  ;;  %638 = vmatprep.mubr.f32.mxu0 %v4048_v0  ;;  %v3516_v20 = vpack.c.bf16 %v768_v59, %v756_v58  ;;  %v4418_v58 = vld [vmem:[#allocation7 + $0xb0] sm:$0xff]  ;;  %v4420_v59 = vld [vmem:[#allocation7 + $0xb8] sm:$0xff] }
  0x69   :  { %3477 = vmatprep.subr.bf16.mxu0 %v4130_v22  ;;  %v1499_v22 = vsub.f32 %v4326_v27, %v5665_v16  ;;  %v1331_v7 = vand.u32 4294901760, %v4418_v58  ;;  %v1334_v8 = vand.u32 4294901760, %v4420_v59  ;;  %v1381_v31 = vand.u32 4294901760, %v1380_v49 }
  0x6a   :  { %3511 = vmatpush1.bf16.msra.mxu1 %v4230_v61  ;;  %v1286_v49 = vand.u32 4294901760, %v1200_v29 }
  0x6b   :  { %3513 = vmatprep.subr.bf16.mxu1 %v3512_v63  ;;  %v4480_v63 = vsub.f32 %v4405_v57, %v1280_v13  ;;  %v4498_v57 = vsub.f32 %v4420_v59, %v1334_v8  ;;  %v4502_v25 = vpack.c.bf16 %v1388_v35, %v1381_v31  ;;  %v5671_v59 = vand.u32 4294901760, %v4489_v10  ;;  %v4529_v31 = vld [vmem:[#allocation7 + $0xd8] sm:$0xff] }
  0x6c   :  { %3479 = vmatpush1.bf16.msra.mxu0 %v4145_v32  ;;  %v4458_v32 = vpack.c.bf16 %v1322_v24, %v1319_v23  ;;  %v1514_v23 = vand.u32 4294901760, %v4430_v11  ;;  %v4474_v24 = vsub.f32 %v4378_v26, %v5655_v12  ;;  %v1527_v11 = vsub.f32 %v4438_v17, %v5653_v9 }
  0x6d   :  { %1007 = vmatmul.mubr.f32.vlgmr.msra.gmra.mrb[0].mxu1 %v4172_v44  ;;  %3529 = vmatprep.subr.bf16.mxu0 %v4403_v56  ;;  %v1500_v44 = vand.u32 4294901760, %v1499_v22  ;;  %v4495_v22 = vsub.f32 %v4418_v58, %v1331_v7  ;;  %v1520_v58 = vsub.f32 %v4434_v4, %v5654_v38  ;;  %v4534_v9 = vsub.f32 %v1200_v29, %v1286_v49  ;;  %v4559_v29 = vld [vmem:[#allocation7 + $0x50] sm:$0xff] }
  0x6e   :  { %3515 = vmatpush1.bf16.msra.mxu1 %v3514_v55  ;;  %1101 = vmatprep.mubr.f32.mxu1 %v4048_v0  ;;  %v1283_v55 = vand.u32 4294901760, %v4462_v21  ;;  %v1402_v62 = vand.u32 4294901760, %v4474_v24  ;;  %v5661_v24 = vand.u32 4294901760, %v4498_v57  ;;  %v4537_v38 = vpack.c.bf16 %v1334_v8, %v1331_v7 }
  0x6f   :  { %640 = vmatmul.mubr.f32.vlgmr.msra.gmra.mrb[0].mxu0 %v4139_v28  ;;  %3517 = vmatprep.subr.bf16.mxu1 %v3516_v20  ;;  %v4491_v20 = vld [vmem:[#allocation7 + $0xc8] sm:$0xff]  ;;  %v3560_v15 = vpack.c.bf16 %v1500_v44, %v1493_v6  ;;  %v4527_v44 = vld [vmem:[#allocation7 + $0xd0] sm:$0xff]  ;;  %v5662_v35 = vand.u32 4294901760, %v4495_v22  ;;  %v3564_v52 = vpack.c.bf16 %v1514_v23, %v1507_v30  ;;  %v1408_v13 = vsub.f32 %v4466_v41, %v5656_v50  ;;  %v4561_v30 = vld [vmem:[#allocation7 + $0x58] sm:$0xff] }
  0x70   :  { %3531 = vmatpush3.bf16.msra.mxu0 %v4444_v18  ;;  %v5669_v40 = vand.u32 4294901760, %v4491_v20  ;;  %v4523_v6 = vsub.f32 %v4462_v21, %v1283_v55  ;;  %v5668_v21 = vand.u32 4294901760, %v4513_v3  ;;  %v4550_v7 = vsub.f32 %v4489_v10, %v5671_v59 }
  0x71   :  { %3533 = vmatprep.subr.bf16.mxu0 %v4458_v32  ;;  %v5678_v8 = vand.u32 4294901760, %v4529_v31  ;;  %v1521_v23 = vand.u32 4294901760, %v1520_v58  ;;  %v4568_v47 = vpack.c.bf16 %v1286_v49, %v1283_v55  ;;  %v1528_v60 = vand.u32 4294901760, %v1527_v11 }
  0x72   :  { %3519 = vmatpush1.bf16.msra.mxu1 %v3518_v46  ;;  %v4515_v46 = vld [vmem:[#allocation7 + $0x48] sm:$0xff]  ;;  %5769 = vst [vmem:[#allocation12_spill] sm:$0xff] %v4550_v7  ;;  %v5673_v50 = vand.u32 4294901760, %v4523_v6  ;;  %v1534_v2 = vsub.f32 %v4495_v22, %v5662_v35  ;;  %v1541_v1 = vsub.f32 %v4498_v57, %v5661_v24  ;;  %v5672_v58 = vand.u32 4294901760, %v4534_v9 }
  0x73   :  { %3521 = vmatprep.subr.bf16.mxu1 %v4203_v39  ;;  %v5663_v39 = vand.u32 4294901760, %v4480_v63  ;;  %v5667_v12 = vand.u32 4294901760, %v4515_v46  ;;  %5771 = vst [vmem:[#allocation14_spill] sm:$0xff] %v4568_v47  ;;  %v4582_v55 = vsub.f32 %v4513_v3, %v5668_v21  ;;  %v5677_v11 = vand.u32 4294901760, %v4559_v29 }
  0x74   :  { %3535 = vmatpush3.bf16.msra.mxu0 %v4486_v53  ;;  %v5675_v24 = vand.u32 4294901760, %v4561_v30  ;;  %v5674_v35 = vand.u32 4294901760, %v4550_v7  ;;  %v4601_v36 = vsub.f32 %v4529_v31, %v5678_v8  ;;  %v3566_v16 = vpack.c.bf16 %v1402_v62, %v1395_v5 }
  0x75   :  { %1103 = vmatmul.mubr.f32.vlgmr.msra.gmra.mrb[0].mxu1 %v4139_v28  ;;  %3537 = vmatprep.subr.bf16.mxu0 %v4500_v14  ;;  %5772 = vst [vmem:[#allocation15_spill] sm:$0xff] %v4582_v55  ;;  %v4587_v49 = vsub.f32 %v4515_v46, %v5667_v12  ;;  %v1409_v37 = vand.u32 4294901760, %v1408_v13  ;;  %v3568_v21 = vpack.c.bf16 %v1528_v60, %v1521_v23  ;;  %v5684_v5 = vand.u32 4294901760, %v4582_v55 }
  0x76   :  { %3523 = vmatpush1.bf16.msra.mxu1 %v4207_v45  ;;  %1181 = vmatprep.mubr.f32.mxu1 %v4048_v0  ;;  %v4555_v0 = vsub.f32 %v4491_v20, %v5669_v40  ;;  %v5670_v45 = vand.u32 4294901760, %v4527_v44  ;;  %5775 = vst [vmem:[#allocation18_spill] sm:$0xff] %v4601_v36  ;;  %v1535_v40 = vand.u32 4294901760, %v1534_v2  ;;  %v1429_v59 = vsub.f32 %v4534_v9, %v5672_v58 }
  0x77   :  { %3525 = vmatprep.subr.bf16.mxu1 %v4213_v48  ;;  %v1415_v48 = vsub.f32 %v4480_v63, %v5663_v39  ;;  %5773 = vst [vmem:[#allocation16_spill] sm:$0xff] %v4587_v49  ;;  %v5680_v62 = vand.u32 4294901760, %v4587_v49  ;;  %v4617_v13 = vsub.f32 %v4559_v29, %v5677_v11 }
  0x78   :  { %5770 = vst [vmem:[#allocation13_spill] sm:$0xff] %v4555_v0  ;;  %3539 = vmatpush3.bf16.msra.mxu0 %v4525_v19  ;;  %v5676_v39 = vand.u32 4294901760, %v4555_v0 }
  0x79   :  { %3541 = vmatprep.subr.bf16.mxu0 %v4537_v38  ;;  %v1416_v12 = vand.u32 4294901760, %v1415_v48  ;;  %5776 = vst [vmem:[#allocation19_spill] sm:$0xff] %v4617_v13 }
  0x7a   :  { %3527 = vmatpush1.bf16.msra.mxu1 %v4230_v61  ;;  %v4596_v61 = vsub.f32 %v4527_v44, %v5670_v45  ;;  %v1542_v45 = vand.u32 4294901760, %v1541_v1  ;;  %v1548_v1 = vsub.f32 %v4550_v7, %v5674_v35  ;;  %v1555_v2 = vsub.f32 %v4555_v0, %v5676_v39 }
  0x7b   :  { %3561 = vmatprep.subr.bf16.mxu1 %v3560_v15  ;;  %v1422_v15 = vsub.f32 %v4523_v6, %v5673_v50  ;;  %v3570_v23 = vpack.c.bf16 %v1416_v12, %v1409_v37  ;;  %v1430_v50 = vand.u32 4294901760, %v1429_v59  ;;  %v1443_v35 = vsub.f32 %v4587_v49, %v5680_v62 }
  0x7c   :  { %5774 = vst [vmem:[#allocation17_spill] sm:$0xff] %v4596_v61  ;;  %3543 = vmatpush3.bf16.msra.mxu0 %v4568_v47  ;;  %v5679_v60 = vand.u32 4294901760, %v4596_v61  ;;  %v3572_v48 = vpack.c.bf16 %v1542_v45, %v1535_v40  ;;  %v1549_v11 = vand.u32 4294901760, %v1548_v1  ;;  %v1556_v8 = vand.u32 4294901760, %v1555_v2 }
  0x7d   :  { %1183 = vmatmul.mubr.f32.vlgmr.msra.gmra.mrb[0].mxu1 %v4139_v28  ;;  %v4622_v28 = vsub.f32 %v4561_v30, %v5675_v24  ;;  %v1423_v58 = vand.u32 4294901760, %v1422_v15  ;;  %v5683_v24 = vand.u32 4294901760, %v4617_v13  ;;  %v1444_v40 = vand.u32 4294901760, %v1443_v35 }
  0x7e   :  { %3563 = vmatpush3.bf16.msra.mxu1 %v4502_v25  ;;  %v5681_v25 = vand.u32 4294901760, %v4601_v36  ;;  %v1562_v37 = vsub.f32 %v4596_v61, %v5679_v60  ;;  %v3576_v15 = vpack.c.bf16 %v1556_v8, %v1549_v11  ;;  %v4658_v11 = vld [vmem:[#allocation7 + $0x60] sm:$0xff]  ;;  %v5778_v7 = vand.u32 4294901760, %v4489_v10 }
  0x7f   :  { %5777 = vst [vmem:[#allocation20_spill] sm:$0xff] %v4622_v28  ;;  %3565 = vmatprep.subr.bf16.mxu1 %v3564_v52  ;;  %v1436_v52 = vsub.f32 %v4582_v55, %v5684_v5  ;;  %v5682_v39 = vand.u32 4294901760, %v4622_v28  ;;  %v3574_v12 = vpack.c.bf16 %v1430_v50, %v1423_v58  ;;  %v1450_v45 = vsub.f32 %v4617_v13, %v5683_v24  ;;  %v4652_v58 = vld [vmem:[#allocation7 + $0xe0] sm:$0xff] }
  0x80   :  { %v1563_v1 = vand.u32 4294901760, %v1562_v37  ;;  %v1301_v37 = vand.u32 4294901760, %v4658_v11 }
  0x81   :  { %v1437_v59 = vand.u32 4294901760, %v1436_v52  ;;  %v1451_v62 = vand.u32 4294901760, %v1450_v45  ;;  %v1349_v52 = vand.u32 4294901760, %v4652_v58 }
  0x82   :  { %3567 = vmatpush3.bf16.msra.mxu1 %v3566_v16  ;;  %v1569_v16 = vsub.f32 %v4601_v36, %v5681_v25 }
  0x83   :  { %3569 = vmatprep.subr.bf16.mxu1 %v3568_v21  ;;  %v1457_v21 = vsub.f32 %v4622_v28, %v5682_v39  ;;  %v3578_v60 = vpack.c.bf16 %v1444_v40, %v1437_v59  ;;  %v1223_v59 = vld [vmem:[#allocation7 + $0xf0] sm:$0xff]  ;;  %v1224_v40 = vld [vmem:[#allocation7 + $0xf8] sm:$0xff] }
  0x84   :  { %v1570_v2 = vand.u32 4294901760, %v1569_v16 }
  0x85   :  { %v1458_v25 = vand.u32 4294901760, %v1457_v21 }
  0x86   :  { %3571 = vmatpush3.bf16.msra.mxu1 %v3570_v23  ;;  %v3580_v50 = vpack.c.bf16 %v1570_v2, %v1563_v1  ;;  %v4654_v23 = vld [vmem:[#allocation7 + $0xe8] sm:$0xff]  ;;  %v1358_v1 = vand.u32 4294901760, %v1224_v40  ;;  %v1207_v2 = vld [vmem:[#allocation7 + $0x70] sm:$0xff] }
  0x87   :  { %3573 = vmatprep.subr.bf16.mxu1 %v3572_v48  ;;  %v3582_v35 = vpack.c.bf16 %v1458_v25, %v1451_v62  ;;  %v1352_v8 = vand.u32 4294901760, %v4654_v23  ;;  %v1206_v48 = vld [vmem:[#allocation7 + $0x68] sm:$0xff] }
  0x88   :  { %v1304_v16 = vand.u32 4294901760, %v1206_v48  ;;  %v4684_v5 = vsub.f32 %v1224_v40, %v1358_v1 }
  0x89   :  { %v4665_v62 = vsub.f32 %v4654_v23, %v1352_v8  ;;  %v1307_v23 = vand.u32 4294901760, %v1207_v2 }
  0x8a   :  { %3575 = vmatpush3.bf16.msra.mxu1 %v3574_v12  ;;  %v4662_v12 = vsub.f32 %v4652_v58, %v1349_v52  ;;  %v4670_v25 = vsub.f32 %v1206_v48, %v1304_v16 }
  0x8b   :  { %3577 = vmatprep.subr.bf16.mxu1 %v3576_v15  ;;  %v5696_v21 = vand.u32 4294901760, %v4665_v62  ;;  %v1355_v15 = vand.u32 4294901760, %v1223_v59  ;;  %v4692_v36 = vsub.f32 %v1207_v2, %v1307_v23 }
  0x8c   :  { %v5693_v45 = vand.u32 4294901760, %v4662_v12  ;;  %v5704_v58 = vand.u32 4294901760, %v4670_v25 }
  0x8d   :  { %v1583_v48 = vsub.f32 %v4665_v62, %v5696_v21  ;;  %v4682_v24 = vsub.f32 %v1223_v59, %v1355_v15  ;;  %v5706_v59 = vand.u32 4294901760, %v4684_v5 }
  0x8e   :  { %3579 = vmatpush3.bf16.msra.mxu1 %v3578_v60  ;;  %v4668_v60 = vsub.f32 %v4658_v11, %v1301_v37  ;;  %v1576_v11 = vsub.f32 %v4662_v12, %v5693_v45  ;;  %v1471_v13 = vsub.f32 %v4670_v25, %v5704_v58  ;;  %v5779_v58 = vand.u32 4294901760, %v4491_v20 }
  0x8f   :  { %3581 = vmatprep.subr.bf16.mxu1 %v3580_v50  ;;  %v1208_v50 = vld [vmem:[#allocation7 + $0x78] sm:$0xff]  ;;  %v1584_v49 = vand.u32 4294901760, %v1583_v48  ;;  %v5707_v21 = vand.u32 4294901760, %v4682_v24  ;;  %v5781_v48 = vand.u32 4294901760, %v4513_v3  ;;  %v1597_v10 = vsub.f32 %v4684_v5, %v5706_v59  ;;  %v5802_v59 = vld [vmem:[#allocation13_spill] sm:$0xff] }
  0x90   :  { %v1310_v39 = vand.u32 4294901760, %v1208_v50  ;;  %v1577_v45 = vand.u32 4294901760, %v1576_v11  ;;  %v1472_v55 = vand.u32 4294901760, %v1471_v13  ;;  %v4704_v2 = vpack.c.bf16 %v5779_v58, %v5778_v7 }
  0x91   :  { %v1590_v11 = vsub.f32 %v4682_v24, %v5707_v21  ;;  %v5784_v20 = vand.u32 4294901760, %v4692_v36  ;;  %v5786_v58 = vand.u32 4294901760, %v4529_v31  ;;  %v4743_v31 = vpack.c.bf16 %v1304_v16, %v1301_v37 }
  0x92   :  { %3583 = vmatpush3.bf16.msra.mxu1 %v3582_v35  ;;  %v5701_v35 = vand.u32 4294901760, %v4668_v60  ;;  %v4694_v61 = vsub.f32 %v1208_v50, %v1310_v39  ;;  %5780 = vst [vmem:[#allocation21_spill] sm:$0xff] %v4704_v2  ;;  %v3584_v50 = vpack.c.bf16 %v1584_v49, %v1577_v45  ;;  %3545 = vmatprep.subr.bf16.mxu0 %v4704_v2  ;;  %v5785_v45 = vand.u32 4294901760, %v4527_v44 }
  0x93   :  { %v1478_v7 = vsub.f32 %v4692_v36, %v5784_v20  ;;  %v1591_v49 = vand.u32 4294901760, %v1590_v11  ;;  %v5789_v11 = vand.u32 4294901760, %v4561_v30  ;;  %v4740_v44 = vpack.c.bf16 %v1352_v8, %v1349_v52  ;;  %5792 = vst [vmem:[#allocation26_spill] sm:$0xff] %v4743_v31  ;;  %v4836_v52 = vld [vmem:[#allocation7 + $0x1f8] sm:$0xff]  ;;  %v4851_v8 = vld [vmem:[#allocation7 + $0x170] sm:$0xff] }
  0x94   :  { %v1464_v28 = vsub.f32 %v4668_v60, %v5701_v35  ;;  %v5705_v35 = vand.u32 4294901760, %v4694_v61  ;;  %3585 = vmatprep.subr.bf16.mxu1 %v3584_v50  ;;  %v5788_v50 = vand.u32 4294901760, %v4559_v29  ;;  %v4749_v29 = vpack.c.bf16 %v1310_v39, %v1307_v23  ;;  %v4830_v39 = vld [vmem:[#allocation7 + $0x168] sm:$0xff]  ;;  %5806 = vst [vmem:[#allocation36_spill] sm:$0xff] %v4836_v52 }
  0x95   :  { %5791 = vst [vmem:[#allocation25_spill] sm:$0xff] %v4740_v44  ;;  %v3592_v30 = vpack.c.bf16 %v4326_v27, %v4320_v42  ;;  %v79_v16 = vlaneseq  ;;  %5804 = vst [vmem:[#allocation13_spill] sm:$0xff] %v4830_v39 }
  0x96   :  { %v1465_v40 = vand.u32 4294901760, %v1464_v28  ;;  %v5782_v28 = vand.u32 4294901760, %v4515_v46  ;;  %v1485_v3 = vsub.f32 %v4694_v61, %v5705_v35  ;;  %v1598_v46 = vand.u32 4294901760, %v1597_v10 }
  0x97   :  { %v4736_v20 = vpack.c.bf16 %v5789_v11, %v5788_v50 }
  0x98   :  { %v4713_v13 = vpack.c.bf16 %v5782_v28, %v5781_v48  ;;  %v3586_v0 = vpack.c.bf16 %v1472_v55, %v1465_v40  ;;  %v1479_v55 = vand.u32 4294901760, %v1478_v7  ;;  %v4730_v40 = vpack.c.bf16 %v5786_v58, %v5785_v45 }
  0x99   :  { %v1486_v48 = vand.u32 4294901760, %v1485_v3  ;;  %v3588_v28 = vpack.c.bf16 %v1598_v46, %v1591_v49  ;;  %5790 = vst [vmem:[#allocation24_spill] sm:$0xff] %v4736_v20 }
  0x9a   :  { %5783 = vst [vmem:[#allocation22_spill] sm:$0xff] %v4713_v13  ;;  %3547 = vmatpush3.bf16.msra.mxu0 %v4713_v13  ;;  %3587 = vmatpush3.bf16.msra.mxu1 %v3586_v0  ;;  %5787 = vst [vmem:[#allocation23_spill] sm:$0xff] %v4730_v40  ;;  %v4747_v0 = vpack.c.bf16 %v1358_v1, %v1355_v15  ;;  %v4763_v15 = vshrl.u32 %v79_v16, 7 }
  0x9b   :  { %3549 = vmatprep.subr.bf16.mxu0 %v4730_v40  ;;  %v3590_v35 = vpack.c.bf16 %v1486_v48, %v1479_v55  ;;  %3589 = vmatprep.subr.bf16.mxu1 %v3588_v28 }
  0x9c   :  { %5793 = vst [vmem:[#allocation27_spill] sm:$0xff] %v4747_v0  ;;  %v81_v1 = vsub.s32 0, %v4763_v15  ;;  %v85_v23 = vsub.s32 1, %v4763_v15 }
  0x9e   :  { %3551 = vmatpush3.bf16.msra.mxu0 %v4736_v20  ;;  %3591 = vmatpush3.bf16.msra.mxu1 %v3590_v35  ;;  %v4769_v35 = vld [vmem:[%s5649_s2] sm:$0xf] }
  0x9f   :  { %3625 = vmatprep.subr.bf16.mxu1 %v4403_v56  ;;  %3553 = vmatprep.subr.bf16.mxu0 %v4740_v44  ;;  %v82_v10 = vrot.slane %v4769_v35, %v81_v1  ;;  %v86_v7 = vrot.slane %v4769_v35, %v85_v23 }
  0xa2   :  { %3555 = vmatpush3.bf16.msra.mxu0 %v4743_v31 }
  0xa3   :  { %3557 = vmatprep.subr.bf16.mxu0 %v4747_v0 }
  0xa6   :  { %3559 = vmatpush3.bf16.msra.mxu0 %v4749_v29 }
  0xa7   :  { %3593 = vmatprep.subr.bf16.mxu0 %v3592_v30 }
 0x142   :  { %v641_v49 = vpop.f32.mrb[0].mxu0 }
 0x143   :  { %v3912_v3 = vadd.f32 %v641_v49, %v82_v10  ;;  %v643_v46 = vpop.f32.mrb[1].mxu0 }
 0x144   :  { %v3913_v55 = vadd.f32 %v643_v46, %v86_v7  ;;  %v3594_v7 = vpack.c.bf16 %v4336_v34, %v4331_v33  ;;  %v3596_v46 = vpack.c.bf16 %v4347_v54, %v4342_v43 }
 0x145   :  { %v1189_v45 = vmax.f32 %v3912_v3, 0.0 }
 0x146   :  { %v1190_v58 = vmax.f32 %v3913_v55, 0.0 }
 0x147   :  { %v4774_v48 = vand.u32 4294901760, %v1189_v45 }
 0x148   :  { %v4776_v28 = vand.u32 4294901760, %v1190_v58 }
 0x149   :  { %5794 = vst [vmem:[#allocation28_spill] sm:$0xff] %v4774_v48  ;;  %v4779_v50 = vsub.f32 %v1189_v45, %v4774_v48  ;;  %v3598_v45 = vpack.c.bf16 %v4378_v26, %v4358_v51 }
 0x14a   :  { %v1361_v11 = vsub.f32 %v1190_v58, %v4776_v28  ;;  %1601 = vmatprep.mubr.f32.mxu1 %v4776_v28  ;;  %v3600_v58 = vpack.c.bf16 %v4438_v17, %v4434_v4 }
 0x14b   :  { %v5708_v30 = vand.u32 4294901760, %v4779_v50  ;;  %1603 = vmatmul.mubr.f32.vlgmr.msra.gmra.mrb[2].mxu1 %v4774_v48 }
 0x14c   :  { %3627 = vmatpush3.bf16.msra.mxu1 %v4444_v18  ;;  %v1362_v16 = vand.u32 4294901760, %v1361_v11 }
 0x14d   :  { %v1369_v1 = vsub.f32 %v4779_v50, %v5708_v30  ;;  %3629 = vmatprep.subr.bf16.mxu1 %v4458_v32  ;;  %v4834_v30 = vld [vmem:[#allocation7 + $0x1f0] sm:$0xff] }
 0x14e   :  { %1845 = vmatprep.mubr.f32.mxu1 %v1362_v16  ;;  %v1363_v23 = vsub.f32 %v1361_v11, %v1362_v16  ;;  %v3602_v16 = vpack.c.bf16 %v4480_v63, %v4466_v41  ;;  %5805 = vst [vmem:[#allocation35_spill] sm:$0xff] %v4834_v30 }
 0x14f   :  { %v1370_v3 = vand.u32 4294901760, %v1369_v1  ;;  %v3604_v1 = vpack.c.bf16 %v4498_v57, %v4495_v22 }
 0x150   :  { %3631 = vmatpush3.bf16.msra.mxu1 %v4486_v53  ;;  %v1364_v10 = vand.u32 4294901760, %v1363_v23  ;;  %v4793_v49 = vpop.f32.mrb[0].mxu1  ;;  %v4812_v23 = vld [vmem:[#allocation7 + $0x150] sm:$0xff] }
 0x151   :  { %5795 = vst [vmem:[#allocation29_spill] sm:$0xff] %v4793_v49  ;;  %3633 = vmatprep.subr.bf16.mxu1 %v4500_v14  ;;  %v4798_v55 = vpop.f32.mrb[1].mxu1  ;;  %5797 = vst [vmem:[#allocation31_spill] sm:$0xff] %v4812_v23  ;;  %v5809_v49 = vand.u32 4294901760, %v4812_v23 }
 0x152   :  { %5796 = vst [vmem:[#allocation30_spill] sm:$0xff] %v4798_v55  ;;  %1365 = vmatprep.mubr.f32.mxu0 %v1364_v10  ;;  %v3606_v10 = vpack.c.bf16 %v4534_v9, %v4523_v6 }
 0x153   :  { %1371 = vmatmul.mubr.f32.vlgmr.msra.gmra.mrb[2].mxu0 %v1370_v3  ;;  %v5808_v3 = vld [vmem:[#allocation16_spill] sm:$0xff]  ;;  %v4844_v48 = vsub.f32 %v4812_v23, %v5809_v49  ;;  %v5817_v23 = vld [vmem:[#allocation19_spill] sm:$0xff] }
 0x154   :  { %3595 = vmatpush3.bf16.msra.mxu0 %v3594_v7  ;;  %3635 = vmatpush3.bf16.msra.mxu1 %v4525_v19  ;;  %v5818_v49 = vld [vmem:[#allocation20_spill] sm:$0xff] }
 0x155   :  { %1738 = vmatprep.mubr.f32.mxu0 %v1361_v11  ;;  %3597 = vmatprep.subr.bf16.mxu0 %v3596_v46  ;;  %v4814_v11 = vld [vmem:[#allocation7 + $0x158] sm:$0xff]  ;;  %v4821_v46 = vld [vmem:[#allocation7 + $0x1e0] sm:$0xff] }
 0x156   :  { %3637 = vmatprep.subr.bf16.mxu1 %v4537_v38  ;;  %5798 = vst [vmem:[#allocation32_spill] sm:$0xff] %v4814_v11  ;;  %5799 = vst [vmem:[#allocation33_spill] sm:$0xff] %v4821_v46 }
 0x158   :  { %3599 = vmatpush3.bf16.msra.mxu0 %v3598_v45  ;;  %3639 = vmatpush3.bf16.msra.mxu1 %v4568_v47  ;;  %v4823_v45 = vld [vmem:[#allocation7 + $0x1e8] sm:$0xff]  ;;  %v3614_v47 = vpack.c.bf16 %v5818_v49, %v5817_v23  ;;  %v4965_v49 = vld [vmem:[#allocation7 + $0x198] sm:$0xff] }
 0x159   :  { %3601 = vmatprep.subr.bf16.mxu0 %v3600_v58  ;;  %3641 = vmatprep.subr.bf16.mxu1 %v4704_v2  ;;  %5800 = vst [vmem:[#allocation34_spill] sm:$0xff] %v4823_v45  ;;  %v5801_v58 = vld [vmem:[#allocation12_spill] sm:$0xff] }
 0x15a   :  { %v3608_v21 = vpack.c.bf16 %v5802_v59, %v5801_v58 }
 0x15c   :  { %3603 = vmatpush3.bf16.msra.mxu0 %v3602_v16  ;;  %3643 = vmatpush3.bf16.msra.mxu1 %v4713_v13  ;;  %v4828_v16 = vld [vmem:[#allocation7 + $0x160] sm:$0xff]  ;;  %v4853_v13 = vld [vmem:[#allocation7 + $0x178] sm:$0xff] }
 0x15d   :  { %3605 = vmatprep.subr.bf16.mxu0 %v3604_v1  ;;  %3645 = vmatprep.subr.bf16.mxu1 %v4730_v40  ;;  %5803 = vst [vmem:[#allocation12_spill] sm:$0xff] %v4828_v16  ;;  %v5807_v1 = vld [vmem:[#allocation15_spill] sm:$0xff]  ;;  %v5810_v40 = vand.u32 4294901760, %v4814_v11  ;;  %5812 = vst [vmem:[#allocation16_spill] sm:$0xff] %v4853_v13 }
 0x15e   :  { %v3610_v7 = vpack.c.bf16 %v5808_v3, %v5807_v1  ;;  %5811 = vst [vmem:[#allocation15_spill] sm:$0xff] %v4851_v8 }
 0x15f   :  { %v4849_v37 = vsub.f32 %v4814_v11, %v5810_v40  ;;  %v5815_v40 = vand.u32 4294901760, %v4821_v46 }
 0x160   :  { %3607 = vmatpush3.bf16.msra.mxu0 %v3606_v10  ;;  %3647 = vmatpush3.bf16.msra.mxu1 %v4736_v20  ;;  %v5813_v10 = vld [vmem:[#allocation17_spill] sm:$0xff]  ;;  %v5814_v20 = vld [vmem:[#allocation18_spill] sm:$0xff] }
 0x161   :  { %3609 = vmatprep.subr.bf16.mxu0 %v3608_v21  ;;  %3649 = vmatprep.subr.bf16.mxu1 %v4740_v44  ;;  %v3612_v2 = vpack.c.bf16 %v5814_v20, %v5813_v10  ;;  %v4865_v11 = vsub.f32 %v4821_v46, %v5815_v40  ;;  %v5816_v21 = vand.u32 4294901760, %v4823_v45  ;;  %v4880_v46 = vld [vmem:[#allocation7 + $0x180] sm:$0xff]  ;;  %v5822_v10 = vand.u32 4294901760, %v4834_v30 }
 0x162   :  { %v5823_v40 = vand.u32 4294901760, %v4836_v52 }
 0x163   :  { %v4870_v44 = vsub.f32 %v4823_v45, %v5816_v21  ;;  %v5819_v21 = vand.u32 4294901760, %v4828_v16  ;;  %v4892_v45 = vld [vmem:[#allocation7 + $0x188] sm:$0xff] }
 0x164   :  { %3611 = vmatpush3.bf16.msra.mxu0 %v3610_v7  ;;  %3651 = vmatpush3.bf16.msra.mxu1 %v4743_v31  ;;  %v5820_v7 = vand.u32 4294901760, %v4830_v39 }
 0x165   :  { %3613 = vmatprep.subr.bf16.mxu0 %v3612_v2  ;;  %3653 = vmatprep.subr.bf16.mxu1 %v4747_v0  ;;  %v4885_v20 = vsub.f32 %v4828_v16, %v5819_v21  ;;  %v4897_v2 = vsub.f32 %v4834_v30, %v5822_v10  ;;  %v4902_v0 = vsub.f32 %v4836_v52, %v5823_v40  ;;  %v5824_v21 = vand.u32 4294901760, %v4844_v48 }
 0x166   :  { %v4890_v55 = vsub.f32 %v4830_v39, %v5820_v7  ;;  %v5825_v16 = vand.u32 4294901760, %v4849_v37  ;;  %v4910_v7 = vld [vmem:[#allocation7 + $0x100] sm:$0xff]  ;;  %v4912_v39 = vld [vmem:[#allocation7 + $0x108] sm:$0xff]  ;;  %v5827_v30 = vand.u32 4294901760, %v4851_v8  ;;  %v5829_v40 = vand.u32 4294901760, %v4853_v13 }
 0x167   :  { %v5835_v10 = vand.u32 4294901760, %v4779_v50 }
 0x168   :  { %5821 = vst [vmem:[#allocation37_spill] sm:$0xff] %v4890_v55  ;;  %v4908_v31 = vpack.c.bf16 %v5825_v16, %v5824_v21  ;;  %v4919_v23 = vsub.f32 %v4851_v8, %v5827_v30  ;;  %v4924_v52 = vsub.f32 %v4853_v13, %v5829_v40  ;;  %3615 = vmatpush3.bf16.msra.mxu0 %v3614_v47  ;;  %v5832_v40 = vand.u32 4294901760, %v4865_v11  ;;  %v4947_v30 = vld [vmem:[#allocation7 + $0x190] sm:$0xff] }
 0x169   :  { %3655 = vmatpush3.bf16.msra.mxu1 %v4749_v29  ;;  %v5831_v21 = vpack.c.bf16 %v4665_v62, %v4662_v12  ;;  %v5833_v47 = vand.u32 4294901760, %v4870_v44  ;;  %v5839_v13 = vpack.c.bf16 %v4670_v25, %v4668_v60  ;;  %v5842_v8 = vand.u32 4294901760, %v4897_v2 }
 0x16a   :  { %5826 = vst [vmem:[#allocation38_spill] sm:$0xff] %v4908_v31  ;;  %5828 = vst [vmem:[#allocation39_spill] sm:$0xff] %v4919_v23  ;;  %3689 = vmatprep.subr.bf16.mxu1 %v4403_v56  ;;  %v5841_v56 = vand.u32 4294901760, %v4326_v27  ;;  %v5848_v27 = vand.u32 4294901760, %v4892_v45 }
 0x16b   :  { %5830 = vst [vmem:[#allocation40_spill] sm:$0xff] %v4924_v52  ;;  %3617 = vmatprep.subr.bf16.mxu0 %v5831_v21  ;;  %v4939_v31 = vpack.c.bf16 %v5833_v47, %v5832_v40  ;;  %v5836_v40 = vand.u32 4294901760, %v4885_v20  ;;  %v5837_v47 = vand.u32 4294901760, %v4890_v55 }
 0x16c   :  { %1849 = vmatmul.mubr.f32.vlgmr.msra.gmra.mrb[4].mxu1 %v5835_v10  ;;  %3619 = vmatpush3.bf16.msra.mxu0 %v5839_v13  ;;  %v5840_v10 = vand.u32 4294901760, %v4320_v42  ;;  %v5845_v13 = vpack.c.bf16 %v4684_v5, %v4682_v24 }
 0x16d   :  { %5834 = vst [vmem:[#allocation41_spill] sm:$0xff] %v4939_v31  ;;  %v4955_v16 = vpack.c.bf16 %v5837_v47, %v5836_v40  ;;  %3691 = vmatpush3.bf16.msra.mxu1 %v4444_v18  ;;  %v5843_v31 = vand.u32 4294901760, %v4902_v0  ;;  %2119 = vmatprep.mubr.f32.mxu1 %v4776_v28  ;;  %v5846_v18 = vand.u32 4294901760, %v4880_v46  ;;  %v5850_v40 = vand.u32 4294901760, %v4919_v23 }
 0x16e   :  { %v3656_v21 = vpack.c.bf16 %v5841_v56, %v5840_v10  ;;  %3621 = vmatprep.subr.bf16.mxu0 %v5845_v13  ;;  %v4985_v56 = vsub.f32 %v4892_v45, %v5848_v27  ;;  %3693 = vmatprep.subr.bf16.mxu1 %v4458_v32  ;;  %v5853_v47 = vand.u32 4294901760, %v4910_v7  ;;  %v5855_v13 = vand.u32 4294901760, %v4912_v39 }
 0x16f   :  { %5838 = vst [vmem:[#allocation42_spill] sm:$0xff] %v4955_v16  ;;  %v4971_v55 = vpack.c.bf16 %v5843_v31, %v5842_v8  ;;  %v4980_v42 = vsub.f32 %v4880_v46, %v5846_v18  ;;  %v5851_v31 = vand.u32 4294901760, %v4924_v52  ;;  %v5858_v32 = vand.u32 4294901760, %v4331_v33 }
 0x170   :  { %5849 = vst [vmem:[#allocation45_spill] sm:$0xff] %v4985_v56  ;;  %v4997_v10 = vsub.f32 %v4910_v7, %v5853_v47  ;;  %v5002_v18 = vsub.f32 %v4912_v39, %v5855_v13  ;;  %v93_v13 = vsub.s32 3, %v4763_v15  ;;  %v5860_v27 = vand.u32 4294901760, %v4342_v43 }
 0x171   :  { %5844 = vst [vmem:[#allocation43_spill] sm:$0xff] %v4971_v55  ;;  %5847 = vst [vmem:[#allocation44_spill] sm:$0xff] %v4980_v42  ;;  %v4991_v8 = vpack.c.bf16 %v5851_v31, %v5850_v40  ;;  %v5005_v55 = vld [vmem:[#allocation7 + $0x110] sm:$0xff]  ;;  %v5857_v40 = vpack.c.bf16 %v4694_v61, %v4692_v36  ;;  %3695 = vmatpush3.bf16.msra.mxu1 %v4486_v53  ;;  %v5859_v31 = vand.u32 4294901760, %v4336_v34  ;;  %v5861_v16 = vand.u32 4294901760, %v4347_v54  ;;  %v5050_v53 = vld [vmem:[#allocation7 + $0x1a0] sm:$0xff] }
 0x172   :  { %5854 = vst [vmem:[#allocation47_spill] sm:$0xff] %v4997_v10  ;;  %5856 = vst [vmem:[#allocation48_spill] sm:$0xff] %v5002_v18  ;;  %3697 = vmatprep.subr.bf16.mxu1 %v4500_v14  ;;  %v5733_v52 = vand.u32 4294901760, %v4980_v42  ;;  %v5032_v14 = vld [vmem:[#allocation7 + $0x118] sm:$0xff]  ;;  %v5864_v43 = vand.u32 4294901760, %v4965_v49  ;;  %v5868_v34 = vand.u32 4294901760, %v4434_v4 }
 0x173   :  { %5852 = vst [vmem:[#allocation46_spill] sm:$0xff] %v4991_v8  ;;  %3623 = vmatpush3.bf16.msra.mxu0 %v5857_v40  ;;  %v3658_v47 = vpack.c.bf16 %v5859_v31, %v5858_v32  ;;  %v3660_v8 = vpack.c.bf16 %v5861_v16, %v5860_v27  ;;  %v5862_v32 = vand.u32 4294901760, %v4947_v30  ;;  %v94_v16 = vrot.slane %v4769_v35, %v93_v13  ;;  %v5052_v40 = vld [vmem:[#allocation7 + $0x1a8] sm:$0xff] }
 0x174   :  { %3657 = vmatprep.subr.bf16.mxu0 %v3656_v21  ;;  %v5038_v54 = vsub.f32 %v4965_v49, %v5864_v43  ;;  %v5866_v27 = vand.u32 4294901760, %v4358_v51  ;;  %v5867_v31 = vand.u32 4294901760, %v4378_v26  ;;  %v5869_v33 = vand.u32 4294901760, %v4438_v17 }
 0x175   :  { %v5030_v21 = vsub.f32 %v4947_v30, %v5862_v32  ;;  %3699 = vmatpush3.bf16.msra.mxu1 %v4525_v19  ;;  %v5870_v51 = vand.u32 4294901760, %v4985_v56  ;;  %v5871_v17 = vand.u32 4294901760, %v5005_v55  ;;  %v5873_v19 = vand.u32 4294901760, %v4466_v41 }
 0x176   :  { %1741 = vmatmul.mubr.f32.vlgmr.msra.gmra.mrb[4].mxu0 %v4779_v50  ;;  %5865 = vst [vmem:[#allocation50_spill] sm:$0xff] %v5038_v54  ;;  %v3662_v32 = vpack.c.bf16 %v5867_v31, %v5866_v27  ;;  %v3664_v50 = vpack.c.bf16 %v5869_v33, %v5868_v34  ;;  %3701 = vmatprep.subr.bf16.mxu1 %v4537_v38  ;;  %v5875_v33 = vand.u32 4294901760, %v4997_v10  ;;  %v5876_v43 = vand.u32 4294901760, %v5002_v18 }
 0x177   :  { %5863 = vst [vmem:[#allocation49_spill] sm:$0xff] %v5030_v21  ;;  %3659 = vmatpush3.bf16.msra.mxu0 %v3658_v47  ;;  %2015 = vmatprep.mubr.f32.mxu0 %v4776_v28  ;;  %v2354_v28 = vsub.f32 %v4980_v42, %v5733_v52  ;;  %v2361_v26 = vsub.f32 %v4985_v56, %v5870_v51  ;;  %v5877_v51 = vand.u32 4294901760, %v4495_v22  ;;  %v5882_v31 = vand.u32 4294901760, %v5802_v59 }
 0x178   :  { %3661 = vmatprep.subr.bf16.mxu0 %v3660_v8  ;;  %v5065_v47 = vsub.f32 %v5005_v55, %v5871_v17  ;;  %v5874_v8 = vand.u32 4294901760, %v4480_v63  ;;  %v2242_v34 = vsub.f32 %v4997_v10, %v5875_v33  ;;  %v2249_v27 = vsub.f32 %v5002_v18, %v5876_v43  ;;  %v5885_v63 = vld [vmem:[#allocation17_spill] sm:$0xff] }
 0x179   :  { %v5878_v17 = vand.u32 4294901760, %v4498_v57  ;;  %v5880_v33 = vand.u32 4294901760, %v4534_v9  ;;  %v5881_v43 = vand.u32 4294901760, %v5801_v58  ;;  %v5883_v57 = vand.u32 4294901760, %v5807_v1  ;;  %v5889_v9 = vld [vmem:[#allocation14_spill] sm:$0xff] }
 0x17a   :  { %5872 = vst [vmem:[#allocation51_spill] sm:$0xff] %v5065_v47  ;;  %v3666_v13 = vpack.c.bf16 %v5874_v8, %v5873_v19  ;;  %v5879_v8 = vand.u32 4294901760, %v4523_v6  ;;  %v5886_v41 = vand.u32 4294901760, %v5885_v63  ;;  %v5887_v19 = vld [vmem:[#allocation18_spill] sm:$0xff]  ;;  %v5106_v6 = vld [vmem:[#allocation7 + $0x120] sm:$0xff]  ;;  %3703 = vmatpush3.bf16.msra.mxu1 %v5889_v9  ;;  %v2355_v58 = vand.u32 4294901760, %v2354_v28 }
 0x17b   :  { %v3668_v38 = vpack.c.bf16 %v5878_v17, %v5877_v51  ;;  %3663 = vmatpush3.bf16.msra.mxu0 %v3662_v32  ;;  %v3672_v22 = vpack.c.bf16 %v5882_v31, %v5881_v43  ;;  %v5884_v51 = vand.u32 4294901760, %v5808_v3  ;;  %v5888_v32 = vand.u32 4294901760, %v5887_v19  ;;  %v5117_v63 = vld [vmem:[#allocation7 + $0x1b0] sm:$0xff] }
 0x17c   :  { %v3670_v52 = vpack.c.bf16 %v5880_v33, %v5879_v8  ;;  %3665 = vmatprep.subr.bf16.mxu0 %v3664_v50  ;;  %v2362_v59 = vand.u32 4294901760, %v2361_v26  ;;  %v5890_v1 = vand.u32 4294901760, %v5032_v14  ;;  %v5115_v8 = vld [vmem:[#allocation7 + $0x128] sm:$0xff]  ;;  %v5893_v33 = vld [vmem:[#allocation21_spill] sm:$0xff]  ;;  %v2243_v43 = vand.u32 4294901760, %v2242_v34  ;;  %v5906_v34 = vld [vmem:[#allocation22_spill] sm:$0xff] }
 0x17d   :  { %v5098_v17 = vpack.c.bf16 %v5884_v51, %v5883_v57  ;;  %v5104_v4 = vpack.c.bf16 %v5888_v32, %v5886_v41  ;;  %v5892_v41 = vld [vmem:[#allocation30_spill] sm:$0xff]  ;;  %3705 = vmatprep.subr.bf16.mxu1 %v5893_v33  ;;  %v2250_v50 = vand.u32 4294901760, %v2249_v27  ;;  %v5894_v28 = vand.u32 4294901760, %v5030_v21 }
 0x17e   :  { %v5113_v3 = vsub.f32 %v5032_v14, %v5890_v1  ;;  %v5120_v19 = vadd.f32 %v5892_v41, %v94_v16  ;;  %v5895_v57 = vand.u32 4294901760, %v5038_v54  ;;  %v5896_v32 = vand.u32 4294901760, %v5050_v53  ;;  %v5140_v27 = vld [vmem:[#allocation7 + $0x1b8] sm:$0xff]  ;;  %v5900_v41 = vld [vmem:[#allocation19_spill] sm:$0xff]  ;;  %3707 = vmatpush3.bf16.msra.mxu1 %v5906_v34 }
 0x17f   :  { %v2368_v26 = vsub.f32 %v5030_v21, %v5894_v28  ;;  %v5898_v16 = vand.u32 4294901760, %v5052_v40  ;;  %3667 = vmatpush3.bf16.msra.mxu0 %v3666_v13  ;;  %v5901_v33 = vand.u32 4294901760, %v5900_v41  ;;  %v5902_v28 = vld [vmem:[#allocation20_spill] sm:$0xff]  ;;  %v5740_v18 = vand.u32 4294901760, %v5117_v63 }
 0x180   :  { %5891 = vst [vmem:[#allocation17_spill] sm:$0xff] %v5113_v3  ;;  %v2375_v51 = vsub.f32 %v5038_v54, %v5895_v57  ;;  %v5132_v9 = vsub.f32 %v5050_v53, %v5896_v32  ;;  %v5903_v31 = vand.u32 4294901760, %v5902_v28  ;;  %v5904_v54 = vand.u32 4294901760, %v4662_v12  ;;  %3669 = vmatprep.subr.bf16.mxu0 %v3668_v38 }
 0x181   :  { %v5137_v1 = vsub.f32 %v5052_v40, %v5898_v16  ;;  %v5905_v32 = vand.u32 4294901760, %v4665_v62  ;;  %v5742_v16 = vand.u32 4294901760, %v5115_v8  ;;  %v5157_v13 = vpack.c.bf16 %v2362_v59, %v2355_v58  ;;  %v5176_v59 = vld [vmem:[#allocation7 + $0x130] sm:$0xff] }
 0x182   :  { %5897 = vst [vmem:[#allocation18_spill] sm:$0xff] %v5132_v9  ;;  %v5146_v57 = vpack.c.bf16 %v5903_v31, %v5901_v33  ;;  %v5907_v41 = vand.u32 4294901760, %v4668_v60  ;;  %v5908_v31 = vand.u32 4294901760, %v4670_v25  ;;  %v5909_v12 = vand.u32 4294901760, %v5065_v47  ;;  %v5178_v25 = vld [vmem:[#allocation7 + $0x138] sm:$0xff] }
 0x183   :  { %5899 = vst [vmem:[#allocation14_spill] sm:$0xff] %v5137_v1  ;;  %v5152_v21 = vpack.c.bf16 %v5905_v32, %v5904_v54  ;;  %v5741_v54 = vand.u32 4294901760, %v5113_v3  ;;  %v1192_v28 = vmax.f32 %v5120_v19, 0.0  ;;  %v5910_v32 = vld [vmem:[#allocation23_spill] sm:$0xff]  ;;  %v5173_v38 = vpack.c.bf16 %v2250_v50, %v2243_v43  ;;  %v5189_v43 = vld [vmem:[#allocation7 + $0x1c8] sm:$0xff]  ;;  %3671 = vmatpush3.bf16.msra.mxu0 %v3670_v52 }
 0x184   :  { %v5163_v33 = vpack.c.bf16 %v5908_v31, %v5907_v41  ;;  %v5168_v62 = vsub.f32 %v5065_v47, %v5909_v12  ;;  %3709 = vmatprep.subr.bf16.mxu1 %v5910_v32  ;;  %v2369_v58 = vand.u32 4294901760, %v2368_v26  ;;  %v2376_v34 = vand.u32 4294901760, %v2375_v51  ;;  %v5187_v32 = vld [vmem:[#allocation7 + $0x1c0] sm:$0xff]  ;;  %3673 = vmatprep.subr.bf16.mxu0 %v3672_v22 }
 0x185   :  { %v5911_v12 = vand.u32 4294901760, %v5106_v6  ;;  %v5913_v50 = vand.u32 4294901760, %v4682_v24  ;;  %v5914_v26 = vand.u32 4294901760, %v4684_v5  ;;  %v5915_v51 = vand.u32 4294901760, %v4692_v36  ;;  %v5919_v24 = vld [vmem:[#allocation24_spill] sm:$0xff] }
 0x186   :  { %v5916_v31 = vand.u32 4294901760, %v4694_v61  ;;  %v5211_v52 = vsub.f32 %v5117_v63, %v5740_v18  ;;  %3711 = vmatpush3.bf16.msra.mxu1 %v5919_v24  ;;  %v2257_v5 = vand.u32 4294901760, %v5168_v62  ;;  %v2263_v36 = vsub.f32 %v5113_v3, %v5741_v54  ;;  %v5921_v18 = vld [vmem:[#allocation25_spill] sm:$0xff] }
 0x187   :  { %v5185_v19 = vsub.f32 %v5106_v6, %v5911_v12  ;;  %v5195_v60 = vpack.c.bf16 %v5914_v26, %v5913_v50  ;;  %v5206_v12 = vsub.f32 %v5115_v8, %v5742_v16  ;;  %v5220_v50 = vld [vmem:[#allocation7 + $0x140] sm:$0xff]  ;;  %v5222_v26 = vld [vmem:[#allocation7 + $0x148] sm:$0xff]  ;;  %3713 = vmatprep.subr.bf16.mxu1 %v5921_v18  ;;  %v5922_v22 = vand.u32 4294901760, %v5140_v27  ;;  %v5234_v16 = vld [vmem:[#allocation7 + $0x1d0] sm:$0xff]  ;;  %3675 = vmatpush3.bf16.msra.mxu0 %v5098_v17 }
 0x188   :  { %v5201_v41 = vpack.c.bf16 %v5916_v31, %v5915_v51  ;;  %5918 = vst [vmem:[#allocation19_spill] sm:$0xff] %v5211_v52  ;;  %5920 = vst [vmem:[#allocation20_spill] sm:$0xff] %v5222_v26  ;;  %v5224_v51 = vand.u32 4294901760, %v1192_v28  ;;  %v5236_v31 = vld [vmem:[#allocation7 + $0x1d8] sm:$0xff]  ;;  %v3756_v61 = vpack.c.bf16 %v2376_v34, %v2369_v58  ;;  %v5925_v3 = vand.u32 4294901760, %v5132_v9  ;;  %3677 = vmatprep.subr.bf16.mxu0 %v5104_v4 }
 0x189   :  { %5912 = vst [vmem:[#allocation30_spill] sm:$0xff] %v5185_v19  ;;  %5917 = vst [vmem:[#allocation21_spill] sm:$0xff] %v5206_v12  ;;  %v5230_v62 = vsub.f32 %v5140_v27, %v5922_v22  ;;  %v5926_v18 = vand.u32 4294901760, %v5137_v1  ;;  %v5927_v34 = vld [vmem:[#allocation26_spill] sm:$0xff]  ;;  %v5929_v22 = vand.u32 4294901760, %v5178_v25  ;;  %v5931_v24 = vand.u32 4294901760, %v5187_v32 }
 0x18a   :  { %5923 = vst [vmem:[#allocation22_spill] sm:$0xff] %v5234_v16  ;;  %5924 = vst [vmem:[#allocation23_spill] sm:$0xff] %v5236_v31  ;;  %v2382_v47 = vsub.f32 %v5132_v9, %v5925_v3  ;;  %3715 = vmatpush3.bf16.msra.mxu1 %v5927_v34  ;;  %v5928_v3 = vand.u32 4294901760, %v5176_v59  ;;  %v5265_v58 = vsub.f32 %v1192_v28, %v5224_v51  ;;  %v5930_v34 = vld [vmem:[#allocation27_spill] sm:$0xff]  ;;  %v2264_v54 = vand.u32 4294901760, %v2263_v36 }
 0x18b   :  { %v2389_v10 = vsub.f32 %v5137_v1, %v5926_v18  ;;  %v5260_v17 = vsub.f32 %v5178_v25, %v5929_v22  ;;  %3717 = vmatprep.subr.bf16.mxu1 %v5930_v34  ;;  %v5932_v1 = vand.u32 4294901760, %v5189_v43  ;;  %v5933_v28 = vand.u32 4294901760, %v5185_v19  ;;  %3679 = vmatpush3.bf16.msra.mxu0 %v5146_v57 }
 0x18c   :  { %v5255_v18 = vsub.f32 %v5176_v59, %v5928_v3  ;;  %v5272_v3 = vsub.f32 %v5187_v32, %v5931_v24  ;;  %v2383_v9 = vand.u32 4294901760, %v2382_v47  ;;  %v5934_v34 = vand.u32 4294901760, %v5206_v12  ;;  %3681 = vmatprep.subr.bf16.mxu0 %v5152_v21 }
 0x18d   :  { %v5277_v22 = vsub.f32 %v5189_v43, %v5932_v1  ;;  %v2390_v56 = vand.u32 4294901760, %v2389_v10  ;;  %v2270_v42 = vsub.f32 %v5185_v19, %v5933_v28  ;;  %v5935_v24 = vand.u32 4294901760, %v5211_v52 }
 0x18e   :  { %v2277_v4 = vsub.f32 %v5206_v12, %v5934_v34  ;;  %v5936_v1 = vand.u32 4294901760, %v5220_v50  ;;  %v5937_v10 = vand.u32 4294901760, %v5222_v26  ;;  %3719 = vmatpush3.bf16.msra.mxu1 %v4749_v29  ;;  %v5938_v34 = vand.u32 4294901760, %v5234_v16 }
 0x18f   :  { %v2396_v23 = vsub.f32 %v5211_v52, %v5935_v24  ;;  %3753 = vmatprep.subr.bf16.mxu1 %v5157_v13  ;;  %v5940_v21 = vand.u32 4294901760, %v5230_v62  ;;  %v5768_v57 = vand.u32 4294901760, %v5277_v22  ;;  %v3758_v12 = vpack.c.bf16 %v2264_v54, %v2257_v5  ;;  %v5943_v13 = vld [vmem:[#allocation28_spill] sm:$0xff]  ;;  %3683 = vmatpush3.bf16.msra.mxu0 %v5163_v33 }
 0x190   :  { %v5292_v36 = vsub.f32 %v5220_v50, %v5936_v1  ;;  %v5297_v47 = vsub.f32 %v5222_v26, %v5937_v10  ;;  %v5306_v24 = vsub.f32 %v5234_v16, %v5938_v34  ;;  %v5939_v1 = vand.u32 4294901760, %v5236_v31  ;;  %3685 = vmatprep.subr.bf16.mxu0 %v5195_v60 }
 0x191   :  { %v2403_v10 = vsub.f32 %v5230_v62, %v5940_v21  ;;  %v5941_v34 = vand.u32 4294901760, %v4880_v46  ;;  %v5942_v19 = vand.u32 4294901760, %v4892_v45  ;;  %2121 = vmatmul.mubr.f32.vlgmr.msra.gmra.mrb[6].mxu1 %v5943_v13  ;;  %v2278_v29 = vand.u32 4294901760, %v2277_v4 }
 0x192   :  { %v5311_v52 = vsub.f32 %v5236_v31, %v5939_v1  ;;  %v3760_v1 = vpack.c.bf16 %v2390_v56, %v2383_v9  ;;  %v2271_v31 = vand.u32 4294901760, %v2270_v42  ;;  %v2397_v26 = vand.u32 4294901760, %v2396_v23  ;;  %3755 = vmatpush3.bf16.msra.mxu1 %v5173_v38  ;;  %2463 = vmatprep.mubr.f32.mxu1 %v5224_v51 }
 0x193   :  { %v5324_v16 = vpack.c.bf16 %v5942_v19, %v5941_v34  ;;  %v2297_v21 = vand.u32 4294901760, %v5292_v36  ;;  %v2304_v28 = vand.u32 4294901760, %v5297_v47  ;;  %v5944_v46 = vand.u32 4294901760, %v5255_v18  ;;  %3757 = vmatprep.subr.bf16.mxu1 %v3756_v61  ;;  %3687 = vmatpush3.bf16.msra.mxu0 %v5201_v41 }
 0x194   :  { %v5945_v42 = vand.u32 4294901760, %v5260_v17  ;;  %v2423_v9 = vand.u32 4294901760, %v5306_v24  ;;  %v2430_v23 = vand.u32 4294901760, %v5311_v52  ;;  %v5946_v33 = vand.u32 4294901760, %v5265_v58 }
 0x195   :  { %v2284_v45 = vsub.f32 %v5255_v18, %v5944_v46  ;;  %v2404_v38 = vand.u32 4294901760, %v2403_v10  ;;  %v5947_v19 = vand.u32 4294901760, %v5272_v3  ;;  %v2417_v4 = vsub.f32 %v5277_v22, %v5768_v57  ;;  %3721 = vmatprep.subr.bf16.mxu0 %v5324_v16 }
 0x196   :  { %v2291_v56 = vsub.f32 %v5260_v17, %v5945_v42  ;;  %v2225_v54 = vsub.f32 %v5265_v58, %v5946_v33  ;;  %v89_v34 = vsub.s32 2, %v4763_v15  ;;  %v5948_v46 = vand.u32 4294901760, %v4910_v7  ;;  %3759 = vmatpush3.bf16.msra.mxu1 %v3758_v12  ;;  %2017 = vmatmul.mubr.f32.vlgmr.msra.gmra.mrb[6].mxu0 %v5943_v13 }
 0x197   :  { %v2410_v5 = vsub.f32 %v5272_v3, %v5947_v19  ;;  %v5949_v60 = vand.u32 4294901760, %v4912_v39  ;;  %v3762_v42 = vpack.c.bf16 %v2278_v29, %v2271_v31  ;;  %v5950_v10 = vand.u32 4294901760, %v4947_v30  ;;  %3761 = vmatprep.subr.bf16.mxu1 %v3760_v1 }
 0x198   :  { %v5951_v33 = vand.u32 4294901760, %v4965_v49  ;;  %v2298_v57 = vsub.f32 %v5292_v36, %v2297_v21  ;;  %v2305_v15 = vsub.f32 %v5297_v47, %v2304_v28  ;;  %v2285_v39 = vand.u32 4294901760, %v2284_v45 }
 0x199   :  { %v5355_v61 = vpack.c.bf16 %v5949_v60, %v5948_v46  ;;  %v2292_v7 = vand.u32 4294901760, %v2291_v56  ;;  %v2424_v30 = vsub.f32 %v5306_v24, %v2423_v9  ;;  %v2431_v49 = vsub.f32 %v5311_v52, %v2430_v23 }
 0x19a   :  { %v5362_v19 = vpack.c.bf16 %v5951_v33, %v5950_v10  ;;  %v2226_v41 = vand.u32 4294901760, %v2225_v54  ;;  %v3764_v31 = vpack.c.bf16 %v2404_v38, %v2397_v26  ;;  %v2411_v29 = vand.u32 4294901760, %v2410_v5  ;;  %3763 = vmatpush3.bf16.msra.mxu1 %v3762_v42 }
 0x19b   :  { %v2418_v46 = vand.u32 4294901760, %v2417_v4  ;;  %v90_v60 = vrot.slane %v4769_v35, %v89_v34  ;;  %v5952_v12 = vand.u32 4294901760, %v5005_v55  ;;  %v5953_v45 = vand.u32 4294901760, %v5032_v14  ;;  %3723 = vmatpush3.bf16.msra.mxu0 %v5355_v61 }
 0x19c   :  { %2227 = vmatprep.mubr.f32.mxu0 %v2226_v41  ;;  %v2299_v10 = vand.u32 4294901760, %v2298_v57  ;;  %v2306_v33 = vand.u32 4294901760, %v2305_v15  ;;  %v5954_v1 = vand.u32 4294901760, %v4844_v48  ;;  %v5955_v54 = vand.u32 4294901760, %v4849_v37  ;;  %3725 = vmatprep.subr.bf16.mxu0 %v5362_v19 }
 0x19d   :  { %v5383_v56 = vpack.c.bf16 %v5953_v45, %v5952_v12  ;;  %v3766_v55 = vpack.c.bf16 %v2292_v7, %v2285_v39  ;;  %v5956_v14 = vand.u32 4294901760, %v5050_v53  ;;  %v5957_v13 = vand.u32 4294901760, %v5052_v40  ;;  %3765 = vmatprep.subr.bf16.mxu1 %v3764_v31 }
 0x19e   :  { %v2312_v26 = vsub.f32 %v4844_v48, %v5954_v1  ;;  %v2319_v35 = vsub.f32 %v4849_v37, %v5955_v54  ;;  %v2425_v57 = vand.u32 4294901760, %v2424_v30  ;;  %v2432_v5 = vand.u32 4294901760, %v2431_v49 }
 0x19f   :  { %v5397_v38 = vpack.c.bf16 %v5957_v13, %v5956_v14  ;;  %v3768_v4 = vpack.c.bf16 %v2418_v46, %v2411_v29  ;;  %v5958_v34 = vand.u32 4294901760, %v4865_v11  ;;  %v5959_v41 = vand.u32 4294901760, %v4870_v44  ;;  %3727 = vmatpush3.bf16.msra.mxu0 %v5383_v56  ;;  %3767 = vmatpush3.bf16.msra.mxu1 %v3766_v55 }
 0x1a0   :  { %v5960_v39 = vand.u32 4294901760, %v5106_v6  ;;  %v5961_v53 = vand.u32 4294901760, %v5115_v8  ;;  %v5962_v40 = vand.u32 4294901760, %v5117_v63  ;;  %v5963_v30 = vand.u32 4294901760, %v5140_v27  ;;  %v5965_v6 = vld [vmem:[#allocation29_spill] sm:$0xff] }
 0x1a1   :  { %v2438_v15 = vsub.f32 %v4865_v11, %v5958_v34  ;;  %v2445_v42 = vsub.f32 %v4870_v44, %v5959_v41  ;;  %v3770_v31 = vpack.c.bf16 %v2306_v33, %v2299_v10  ;;  %v2313_v29 = vand.u32 4294901760, %v2312_v26  ;;  %3729 = vmatprep.subr.bf16.mxu0 %v5397_v38  ;;  %v5966_v63 = vld [vmem:[#allocation37_spill] sm:$0xff]  ;;  %3769 = vmatprep.subr.bf16.mxu1 %v3768_v4 }
 0x1a2   :  { %v5409_v7 = vpack.c.bf16 %v5961_v53, %v5960_v39  ;;  %v5415_v49 = vpack.c.bf16 %v5963_v30, %v5962_v40  ;;  %v2320_v46 = vand.u32 4294901760, %v2319_v35  ;;  %v5964_v12 = vand.u32 4294901760, %v4885_v20  ;;  %v5974_v53 = vld [vmem:[#allocation39_spill] sm:$0xff] }
 0x1a3   :  { %v3914_v1 = vadd.f32 %v5965_v6, %v90_v60  ;;  %v3772_v8 = vpack.c.bf16 %v2432_v5, %v2425_v57  ;;  %v5967_v54 = vand.u32 4294901760, %v5966_v63  ;;  %v2439_v14 = vand.u32 4294901760, %v2438_v15  ;;  %3771 = vmatpush3.bf16.msra.mxu1 %v3770_v31  ;;  %v5979_v31 = vld [vmem:[#allocation20_spill] sm:$0xff] }
 0x1a4   :  { %v2326_v45 = vsub.f32 %v4885_v20, %v5964_v12  ;;  %v2446_v13 = vand.u32 4294901760, %v2445_v42  ;;  %v5968_v10 = vand.u32 4294901760, %v4897_v2  ;;  %v5969_v26 = vand.u32 4294901760, %v4902_v0  ;;  %3731 = vmatpush3.bf16.msra.mxu0 %v5409_v7 }
 0x1a5   :  { %v2333_v27 = vsub.f32 %v5966_v63, %v5967_v54  ;;  %v5970_v60 = vand.u32 4294901760, %v5176_v59  ;;  %v5971_v55 = vand.u32 4294901760, %v5178_v25  ;;  %v3774_v5 = vpack.c.bf16 %v2320_v46, %v2313_v29  ;;  %3733 = vmatprep.subr.bf16.mxu0 %v5415_v49  ;;  %v5976_v25 = vld [vmem:[#allocation40_spill] sm:$0xff]  ;;  %3773 = vmatprep.subr.bf16.mxu1 %v3772_v8 }
 0x1a6   :  { %v2452_v33 = vsub.f32 %v4897_v2, %v5968_v10  ;;  %v2459_v35 = vsub.f32 %v4902_v0, %v5969_v26  ;;  %v5972_v4 = vand.u32 4294901760, %v5187_v32  ;;  %v5973_v34 = vand.u32 4294901760, %v5189_v43 }
 0x1a7   :  { %v5437_v57 = vpack.c.bf16 %v5971_v55, %v5970_v60  ;;  %v2327_v41 = vand.u32 4294901760, %v2326_v45  ;;  %v1191_v42 = vmax.f32 %v3914_v1, 0.0  ;;  %v2334_v39 = vand.u32 4294901760, %v2333_v27  ;;  %v5981_v1 = vld [vmem:[#allocation22_spill] sm:$0xff]  ;;  %v5983_v27 = vld [vmem:[#allocation23_spill] sm:$0xff]  ;;  %3775 = vmatpush3.bf16.msra.mxu1 %v3774_v5  ;;  %v5987_v55 = vld [vmem:[#allocation32_spill] sm:$0xff] }
 0x1a8   :  { %v5443_v15 = vpack.c.bf16 %v5973_v34, %v5972_v4  ;;  %v5975_v40 = vand.u32 4294901760, %v5974_v53  ;;  %v5977_v30 = vand.u32 4294901760, %v5976_v25  ;;  %v3776_v32 = vpack.c.bf16 %v2446_v13, %v2439_v14 }
 0x1a9   :  { %v2453_v46 = vand.u32 4294901760, %v2452_v33  ;;  %v2460_v43 = vand.u32 4294901760, %v2459_v35  ;;  %3735 = vmatpush3.bf16.msra.mxu0 %v5437_v57  ;;  %v5978_v12 = vand.u32 4294901760, %v5220_v50  ;;  %v5980_v45 = vand.u32 4294901760, %v5979_v31  ;;  %v5985_v33 = vld [vmem:[#allocation31_spill] sm:$0xff] }
 0x1aa   :  { %v2340_v59 = vsub.f32 %v5974_v53, %v5975_v40  ;;  %v2347_v29 = vsub.f32 %v5976_v25, %v5977_v30  ;;  %v5982_v54 = vand.u32 4294901760, %v5981_v1  ;;  %v5984_v10 = vand.u32 4294901760, %v5983_v27  ;;  %3737 = vmatprep.subr.bf16.mxu0 %v5443_v15  ;;  %3777 = vmatprep.subr.bf16.mxu1 %v3776_v32  ;;  %v5993_v32 = vld [vmem:[#allocation12_spill] sm:$0xff] }
 0x1ab   :  { %v5457_v6 = vpack.c.bf16 %v5980_v45, %v5978_v12  ;;  %v5465_v60 = vand.u32 4294901760, %v1191_v42  ;;  %v3778_v8 = vpack.c.bf16 %v2334_v39, %v2327_v41  ;;  %v3780_v50 = vpack.c.bf16 %v2460_v43, %v2453_v46  ;;  %v5989_v41 = vld [vmem:[#allocation33_spill] sm:$0xff]  ;;  %v5997_v45 = vld [vmem:[#allocation35_spill] sm:$0xff] }
 0x1ac   :  { %v5463_v26 = vpack.c.bf16 %v5984_v10, %v5982_v54  ;;  %v2341_v14 = vand.u32 4294901760, %v2340_v59  ;;  %v2348_v13 = vand.u32 4294901760, %v2347_v29  ;;  %v5986_v35 = vand.u32 4294901760, %v5985_v33  ;;  %v5991_v59 = vld [vmem:[#allocation34_spill] sm:$0xff]  ;;  %v5995_v43 = vld [vmem:[#allocation13_spill] sm:$0xff]  ;;  %v5999_v54 = vld [vmem:[#allocation36_spill] sm:$0xff] }
 0x1ad   :  { %3739 = vmatpush3.bf16.msra.mxu0 %v5457_v6  ;;  %v5988_v4 = vand.u32 4294901760, %v5987_v55  ;;  %v5476_v40 = vsub.f32 %v1191_v42, %v5465_v60  ;;  %3779 = vmatpush3.bf16.msra.mxu1 %v3778_v8  ;;  %v5990_v39 = vand.u32 4294901760, %v5989_v41  ;;  %v5992_v30 = vand.u32 4294901760, %v5991_v59  ;;  %v6001_v8 = vld [vmem:[#allocation15_spill] sm:$0xff]  ;;  %v6009_v59 = vld [vmem:[#allocation48_spill] sm:$0xff] }
 0x1ae   :  { %3741 = vmatprep.subr.bf16.mxu0 %v5463_v26  ;;  %v3782_v5 = vpack.c.bf16 %v2348_v13, %v2341_v14  ;;  %3781 = vmatprep.subr.bf16.mxu1 %v3780_v50  ;;  %v5994_v46 = vand.u32 4294901760, %v5993_v32  ;;  %v5996_v12 = vand.u32 4294901760, %v5995_v43  ;;  %v5998_v1 = vand.u32 4294901760, %v5997_v45  ;;  %v6003_v13 = vld [vmem:[#allocation16_spill] sm:$0xff]  ;;  %v6011_v43 = vld [vmem:[#allocation50_spill] sm:$0xff]  ;;  %v6012_v45 = vld [vmem:[#allocation51_spill] sm:$0xff] }
 0x1af   :  { %v5473_v34 = vpack.c.bf16 %v5988_v4, %v5986_v35  ;;  %v5483_v29 = vpack.c.bf16 %v5992_v30, %v5990_v39  ;;  %v2230_v42 = vand.u32 4294901760, %v5476_v40  ;;  %v6000_v27 = vand.u32 4294901760, %v5999_v54  ;;  %v6006_v4 = vld [vmem:[#allocation44_spill] sm:$0xff]  ;;  %v6008_v39 = vld [vmem:[#allocation47_spill] sm:$0xff] }
 0x1b0   :  { %v5490_v31 = vpack.c.bf16 %v5996_v12, %v5994_v46  ;;  %v6002_v14 = vand.u32 4294901760, %v6001_v8  ;;  %v6004_v50 = vand.u32 4294901760, %v6003_v13  ;;  %v6005_v55 = vand.u32 4294901760, %v5265_v58  ;;  %v6010_v46 = vld [vmem:[#allocation49_spill] sm:$0xff]  ;;  %v6015_v8 = vld [vmem:[#allocation14_spill] sm:$0xff] }
 0x1b1   :  { %3743 = vmatpush3.bf16.msra.mxu0 %v5473_v34  ;;  %3783 = vmatpush3.bf16.msra.mxu1 %v3782_v5  ;;  %v5499_v10 = vpack.c.bf16 %v6000_v27, %v5998_v1  ;;  %v2231_v35 = vsub.f32 %v5476_v40, %v2230_v42  ;;  %v6007_v5 = vld [vmem:[#allocation45_spill] sm:$0xff]  ;;  %v3786_v30 = vpack.c.bf16 %v6009_v59, %v6008_v39  ;;  %v6014_v27 = vld [vmem:[#allocation18_spill] sm:$0xff] }
 0x1b2   :  { %3745 = vmatprep.subr.bf16.mxu0 %v5483_v29  ;;  %3817 = vmatprep.subr.bf16.mxu1 %v5324_v16  ;;  %v5507_v33 = vpack.c.bf16 %v6004_v50, %v6002_v14  ;;  %v3784_v41 = vpack.c.bf16 %v6007_v5, %v6006_v4  ;;  %v3788_v12 = vpack.c.bf16 %v6011_v43, %v6010_v46  ;;  %v6013_v1 = vld [vmem:[#allocation17_spill] sm:$0xff]  ;;  %v6016_v13 = vld [vmem:[#allocation30_spill] sm:$0xff] }
 0x1b3   :  { %v2232_v32 = vand.u32 4294901760, %v2231_v35  ;;  %v3790_v54 = vpack.c.bf16 %v6013_v1, %v6012_v45  ;;  %v3792_v14 = vpack.c.bf16 %v6015_v8, %v6014_v27  ;;  %v6017_v50 = vld [vmem:[#allocation21_spill] sm:$0xff] }
 0x1b4   :  { %2465 = vmatmul.mubr.f32.vlgmr.msra.gmra.mrb[8].mxu1 %v5465_v60  ;;  %v3794_v35 = vpack.c.bf16 %v6017_v50, %v6016_v13 }
 0x1b5   :  { %3747 = vmatpush3.bf16.msra.mxu0 %v5490_v31  ;;  %3819 = vmatpush3.bf16.msra.mxu1 %v5355_v61 }
 0x1b6   :  { %2707 = vmatprep.mubr.f32.mxu1 %v6005_v55  ;;  %3749 = vmatprep.subr.bf16.mxu0 %v5499_v10  ;;  %v6018_v55 = vld [vmem:[#allocation19_spill] sm:$0xff] }
 0x1b7   :  { %3821 = vmatprep.subr.bf16.mxu1 %v5362_v19 }
 0x1b9   :  { %3751 = vmatpush3.bf16.msra.mxu0 %v5507_v33  ;;  %3823 = vmatpush3.bf16.msra.mxu1 %v5383_v56 }
 0x1ba   :  { %3785 = vmatprep.subr.bf16.mxu0 %v3784_v41  ;;  %3825 = vmatprep.subr.bf16.mxu1 %v5397_v38  ;;  %v3798_v41 = vpack.c.bf16 %v5260_v17, %v5255_v18 }
 0x1bc   :  { %2233 = vmatmul.mubr.f32.vlgmr.msra.gmra.mrb[8].mxu0 %v2232_v32  ;;  %v3802_v32 = vpack.c.bf16 %v5297_v47, %v5292_v36  ;;  %v6041_v36 = vld [vmem:[#allocation46_spill] sm:$0xff] }
 0x1bd   :  { %3787 = vmatpush3.bf16.msra.mxu0 %v3786_v30  ;;  %2600 = vmatprep.mubr.f32.mxu0 %v5265_v58  ;;  %v3796_v58 = vpack.c.bf16 %v5230_v62, %v6018_v55  ;;  %v3800_v30 = vpack.c.bf16 %v5277_v22, %v5272_v3 }
 0x1be   :  { %3827 = vmatpush3.bf16.msra.mxu1 %v5409_v7  ;;  %3789 = vmatprep.subr.bf16.mxu0 %v3788_v12  ;;  %v3804_v12 = vpack.c.bf16 %v5311_v52, %v5306_v24  ;;  %v6040_v52 = vld [vmem:[#allocation43_spill] sm:$0xff] }
 0x1bf   :  { %3829 = vmatprep.subr.bf16.mxu1 %v5415_v49 }
 0x1c1   :  { %3791 = vmatpush3.bf16.msra.mxu0 %v3790_v54  ;;  %v3806_v54 = vpack.c.bf16 %v4849_v37, %v4844_v48  ;;  %v3812_v37 = vpack.c.bf16 %v4902_v0, %v4897_v2  ;;  %v3814_v48 = vpack.c.bf16 %v5976_v25, %v5974_v53  ;;  %v6021_v0 = vand.u32 4294901760, %v6008_v39 }
 0x1c2   :  { %3831 = vmatpush3.bf16.msra.mxu1 %v5437_v57  ;;  %3793 = vmatprep.subr.bf16.mxu0 %v3792_v14  ;;  %v3808_v14 = vpack.c.bf16 %v4870_v44, %v4865_v11  ;;  %v6019_v44 = vand.u32 4294901760, %v6006_v4  ;;  %v6022_v2 = vand.u32 4294901760, %v6009_v59  ;;  %v6026_v25 = vand.u32 4294901760, %v6013_v1 }
 0x1c3   :  { %3833 = vmatprep.subr.bf16.mxu1 %v5443_v15  ;;  %v6028_v4 = vand.u32 4294901760, %v6015_v8  ;;  %v6031_v39 = vand.u32 4294901760, %v6018_v55 }
 0x1c5   :  { %3795 = vmatpush3.bf16.msra.mxu0 %v3794_v35  ;;  %v3810_v35 = vpack.c.bf16 %v5966_v63, %v4885_v20  ;;  %v6020_v20 = vand.u32 4294901760, %v6007_v5  ;;  %v6024_v63 = vand.u32 4294901760, %v6011_v43 }
 0x1c6   :  { %3835 = vmatpush3.bf16.msra.mxu1 %v5457_v6  ;;  %3797 = vmatprep.subr.bf16.mxu0 %v3796_v58 }
 0x1c7   :  { %3837 = vmatprep.subr.bf16.mxu1 %v5463_v26  ;;  %v3848_v11 = vpack.c.bf16 %v6020_v20, %v6019_v44 }
 0x1c9   :  { %3799 = vmatpush3.bf16.msra.mxu0 %v3798_v41 }
 0x1ca   :  { %3839 = vmatpush3.bf16.msra.mxu1 %v5473_v34  ;;  %3801 = vmatprep.subr.bf16.mxu0 %v3800_v30 }
 0x1cb   :  { %3841 = vmatprep.subr.bf16.mxu1 %v5483_v29 }
 0x1cd   :  { %3803 = vmatpush3.bf16.msra.mxu0 %v3802_v32 }
 0x1ce   :  { %3843 = vmatpush3.bf16.msra.mxu1 %v5490_v31  ;;  %3805 = vmatprep.subr.bf16.mxu0 %v3804_v12 }
 0x1cf   :  { %3845 = vmatprep.subr.bf16.mxu1 %v5499_v10 }
 0x1d1   :  { %3807 = vmatpush3.bf16.msra.mxu0 %v3806_v54 }
 0x1d2   :  { %3847 = vmatpush3.bf16.msra.mxu1 %v5507_v33  ;;  %3809 = vmatprep.subr.bf16.mxu0 %v3808_v14 }
 0x1d3   :  { %3881 = vmatprep.subr.bf16.mxu1 %v5324_v16  ;;  %v3850_v16 = vpack.c.bf16 %v6022_v2, %v6021_v0 }
 0x1d5   :  { %2711 = vmatmul.mubr.f32.vlgmr.msra.gmra.mrb[10].mxu1 %v2230_v42  ;;  %3811 = vmatpush3.bf16.msra.mxu0 %v3810_v35 }
 0x1d6   :  { %3883 = vmatpush3.bf16.msra.mxu1 %v5355_v61  ;;  %2981 = vmatprep.mubr.f32.mxu1 %v5224_v51  ;;  %v6023_v61 = vand.u32 4294901760, %v6010_v46  ;;  %v6033_v46 = vand.u32 4294901760, %v5255_v18  ;;  %v3868_v18 = vpack.c.bf16 %v2430_v23, %v2423_v9  ;;  %v3011_v9 = vld [vmem:[%s5651_s4] ss:$0 sm:$0xff]  ;;  %s4049_s4 = smov [#allocation8]  }
 0x1d7   :  { %3813 = vmatprep.subr.bf16.mxu0 %v3812_v37  ;;  %3885 = vmatprep.subr.bf16.mxu1 %v5362_v19  ;;  %v6025_v19 = vand.u32 4294901760, %v6012_v45  ;;  %v6035_v45 = vand.u32 4294901760, %v5272_v3  ;;  %v6038_v3 = vld [vmem:[#allocation41_spill] sm:$0xff]  ;;  %s3001_s8 = sshll.u32 %s4049_s4, 4  ;;  %s3002_s8 = int_to_ptr.vmem [resolvable:$true] %s3001_s8 }
 0x1d8   :  { %v3852_v53 = vpack.c.bf16 %v6024_v63, %v6023_v61  ;;  %s4013_s9 = scalar_lea.vmem %s3002_s8, 128  ;;  %p4018_p11 = scmp.lt.s32.totalorder %s3002_s8, %s3002_s8 }
 0x1d9   :  { %3815 = vmatpush3.bf16.msra.mxu0 %v3814_v48  ;;  %v3854_v42 = vpack.c.bf16 %v6026_v25, %v6025_v19  ;;  %p4014_p10 = scmp.ne.s32.totalorder %s3002_s8, %s4013_s9  ;;  %p4019_p12 = scmp.lt.s32.totalorder %s4013_s9, %s4013_s9 }
 0x1da   :  { %3887 = vmatpush3.bf16.msra.mxu1 %v5383_v56  ;;  %3849 = vmatprep.subr.bf16.mxu0 %v3848_v11  ;;  %v6027_v56 = vand.u32 4294901760, %v6014_v27 }
 0x1db   :  { %3889 = vmatprep.subr.bf16.mxu1 %v5397_v38  ;;  %v6029_v38 = vand.u32 4294901760, %v6016_v13  ;;  %p4020_p13 = por %p4019_p12, %p4018_p11 }
 0x1dc   :  { %2603 = vmatmul.mubr.f32.vlgmr.msra.gmra.mrb[10].mxu0 %v5476_v40  ;;  %v3856_v5 = vpack.c.bf16 %v6028_v4, %v6027_v56 }
 0x1dd   :  { %3851 = vmatpush3.bf16.msra.mxu0 %v3850_v16  ;;  %2877 = vmatprep.mubr.f32.mxu0 %v5224_v51  ;;  %v6030_v51 = vand.u32 4294901760, %v6017_v50  ;;  %p4021_p0 = pnand %p4020_p13, %p4014_p10 }
 0x1de   :  { %3891 = vmatpush3.bf16.msra.mxu1 %v5409_v7  ;;  %3853 = vmatprep.subr.bf16.mxu0 %v3852_v53  ;;  %v6032_v7 = vand.u32 4294901760, %v5230_v62  ;;  %v3866_v62 = vpack.c.bf16 %v2304_v28, %v2297_v21 }
 0x1df   :  { %3893 = vmatprep.subr.bf16.mxu1 %v5415_v49  ;;  %v3858_v40 = vpack.c.bf16 %v6030_v51, %v6029_v38  ;;  %v6034_v49 = vand.u32 4294901760, %v5260_v17  ;;  %v6037_v17 = vld [vmem:[#allocation38_spill] sm:$0xff] }
 0x1e0   :  { %v3860_v59 = vpack.c.bf16 %v6032_v7, %v6031_v39 }
 0x1e1   :  { %3855 = vmatpush3.bf16.msra.mxu0 %v3854_v42  ;;  %v3862_v43 = vpack.c.bf16 %v6034_v49, %v6033_v46 }
 0x1e2   :  { %3895 = vmatpush3.bf16.msra.mxu1 %v5437_v57  ;;  %3857 = vmatprep.subr.bf16.mxu0 %v3856_v5  ;;  %v6036_v57 = vand.u32 4294901760, %v5277_v22  ;;  %v6039_v22 = vld [vmem:[#allocation42_spill] sm:$0xff] }
 0x1e3   :  { %3897 = vmatprep.subr.bf16.mxu1 %v5443_v15 }
 0x1e4   :  { %v3864_v1 = vpack.c.bf16 %v6036_v57, %v6035_v45 }
 0x1e5   :  { %3859 = vmatpush3.bf16.msra.mxu0 %v3858_v40 }
 0x1e6   :  { %3899 = vmatpush3.bf16.msra.mxu1 %v5457_v6  ;;  %3861 = vmatprep.subr.bf16.mxu0 %v3860_v59 }
 0x1e7   :  { %3901 = vmatprep.subr.bf16.mxu1 %v5463_v26 }
 0x1e9   :  { %3863 = vmatpush3.bf16.msra.mxu0 %v3862_v43 }
 0x1ea   :  { %3903 = vmatpush3.bf16.msra.mxu1 %v5473_v34  ;;  %3865 = vmatprep.subr.bf16.mxu0 %v3864_v1 }
 0x1eb   :  { %3905 = vmatprep.subr.bf16.mxu1 %v5483_v29 }
 0x1ed   :  { %3867 = vmatpush3.bf16.msra.mxu0 %v3866_v62 }
 0x1ee   :  { %3907 = vmatpush3.bf16.msra.mxu1 %v5490_v31  ;;  %3869 = vmatprep.subr.bf16.mxu0 %v3868_v18 }
 0x1ef   :  { %3909 = vmatprep.subr.bf16.mxu1 %v5499_v10 }
 0x1f1   :  { %3871 = vmatpush3.bf16.msra.mxu0 %v6037_v17 }
 0x1f2   :  { %3911 = vmatpush3.bf16.msra.mxu1 %v5507_v33  ;;  %3873 = vmatprep.subr.bf16.mxu0 %v6038_v3 }
 0x1f5   :  { %2983 = vmatmul.mubr.f32.vlgmr.msra.gmra.mrb[12].mxu1 %v5465_v60  ;;  %3875 = vmatpush3.bf16.msra.mxu0 %v6039_v22 }
 0x1f6   :  { %3877 = vmatprep.subr.bf16.mxu0 %v6040_v52 }
 0x1f9   :  { %3879 = vmatpush3.bf16.msra.mxu0 %v6041_v36 }
 0x1fc   :  { %2879 = vmatmul.mubr.f32.vlgmr.msra.gmra.mrb[12].mxu0 %v5465_v60 }
 0x21e   :  { %v3079_v47 = vpop.f32.mrb[2].mxu1 }
 0x21f   :  { %v3080_v28 = vpop.f32.mrb[3].mxu1 }
 0x220   :  { %v3081_v24 = vadd.f32 %v3080_v28, %v3079_v47 }
 0x226   :  { %v3044_v21 = vpop.f32.mrb[2].mxu0 }
 0x227   :  { %v3045_v23 = vpop.f32.mrb[3].mxu0 }
 0x228   :  { %v3046_v15 = vadd.f32 %v3045_v23, %v3044_v21 }
 0x22a   :  { %v1373_v6 = vadd.f32 %v3046_v15, %v3011_v9 }
 0x22c   :  { %v1605_v26 = vadd.f32 %v3081_v24, %v1373_v6 }
 0x23f   :  { %v3149_v34 = vpop.f32.mrb[4].mxu1 }
 0x240   :  { %v3150_v29 = vpop.f32.mrb[5].mxu1 }
 0x241   :  { %v3151_v31 = vadd.f32 %v3150_v29, %v3149_v34 }
 0x249   :  { %v3114_v10 = vpop.f32.mrb[4].mxu0 }
 0x24a   :  { %v3115_v33 = vpop.f32.mrb[5].mxu0 }
 0x24b   :  { %v3116_v27 = vadd.f32 %v3115_v33, %v3114_v10 }
 0x24d   :  { %v1743_v8 = vadd.f32 %v3116_v27, %v1605_v26 }
 0x24f   :  { %v1851_v60 = vadd.f32 %v3151_v31, %v1743_v8 }
 0x264   :  { %v3219_v13 = vpop.f32.mrb[6].mxu1 }
 0x265   :  { %v3220_v50 = vpop.f32.mrb[7].mxu1 }
 0x266   :  { %v3221_v55 = vadd.f32 %v3220_v50, %v3219_v13 }
 0x269   :  { %v3184_v58 = vpop.f32.mrb[6].mxu0 }
 0x26a   :  { %v3185_v41 = vpop.f32.mrb[7].mxu0 }
 0x26b   :  { %v3186_v30 = vadd.f32 %v3185_v41, %v3184_v58 }
 0x26d   :  { %v2019_v32 = vadd.f32 %v3186_v30, %v1851_v60 }
 0x26f   :  { %v2123_v12 = vadd.f32 %v3221_v55, %v2019_v32 }
 0x287   :  { %v3289_v54 = vpop.f32.mrb[8].mxu1 }
 0x288   :  { %v3290_v14 = vpop.f32.mrb[9].mxu1 }
 0x289   :  { %v3291_v35 = vadd.f32 %v3290_v14, %v3289_v54 }
 0x28f   :  { %v3254_v37 = vpop.f32.mrb[8].mxu0 }
 0x290   :  { %v3255_v48 = vpop.f32.mrb[9].mxu0 }
 0x291   :  { %v3256_v44 = vadd.f32 %v3255_v48, %v3254_v37 }
 0x293   :  { %v2235_v20 = vadd.f32 %v3256_v44, %v2123_v12 }
 0x295   :  { %v2467_v11 = vadd.f32 %v3291_v35, %v2235_v20 }
 0x2a8   :  { %v3359_v0 = vpop.f32.mrb[10].mxu1 }
 0x2a9   :  { %v3360_v2 = vpop.f32.mrb[11].mxu1 }
 0x2aa   :  { %v3361_v16 = vadd.f32 %v3360_v2, %v3359_v0 }
 0x2af   :  { %v3324_v61 = vpop.f32.mrb[10].mxu0 }
 0x2b0   :  { %v3325_v63 = vpop.f32.mrb[11].mxu0 }
 0x2b1   :  { %v3326_v53 = vadd.f32 %v3325_v63, %v3324_v61 }
 0x2b3   :  { %v2605_v19 = vadd.f32 %v3326_v53, %v2467_v11 }
 0x2b5   :  { %v2713_v25 = vadd.f32 %v3361_v16, %v2605_v19 }
 0x2c8   :  { %v3429_v42 = vpop.f32.mrb[12].mxu1 }
 0x2c9   :  { %v3430_v56 = vpop.f32.mrb[13].mxu1 }
 0x2ca   :  { %v3431_v4 = vadd.f32 %v3430_v56, %v3429_v42 }
 0x2cf   :  { %v3394_v5 = vpop.f32.mrb[12].mxu0 }
 0x2d0   :  { %v3395_v38 = vpop.f32.mrb[13].mxu0 }
 0x2d1   :  { %v3396_v51 = vadd.f32 %v3395_v38, %v3394_v5 }
 0x2d3   :  { %v2881_v40 = vadd.f32 %v3396_v51, %v2713_v25 }
 0x2d5   :  { %v2985_v39 = vadd.f32 %v3431_v4, %v2881_v40 }
 0x2d7   :  { %v2988_v7 = vmul.f32 %v2985_v39, %v2985_v39 }
 0x2d9   :  { %2989 = vadd.xlane.f32.xlu0 %v2988_v7 }
 0x366   :  { %v2990_v59 = vpop.xlane.xlu0 %2989 }
 0x367   :  { %v2991_v46 = vmax.f32 %v2990_v59, 1e-24 }
 0x369   :  { %3945 = vrsqrt.f32 %v2991_v46 }
 0x373   :  { %v3946_v49 = vpop.eup %3945 }
 0x374   :  { %v2993_v43 = vmul.f32 %v3946_v49, %v2985_v39 }
 0x376   :  { %2994 = vst [vmem:[#allocation8] sm:$0xff] %v2993_v43 }
 0x377   :  { %4024 = shalt.err (!%p4021_p0)
}
 0x378   :  { %s4025_s12 = scalar_lea.hbm %s5652_s5, 128 }
 0x379   :  { %p4026_p1 = scmp.ne.s32.totalorder %s5652_s5, %s4025_s12  ;;  %p4029_p2 = scmp.lt.u32.totalorder %s4025_s12, %s5652_s5 }
 0x37b   :  { %p4031_p3 = pnand %p4029_p2, %p4026_p1 }
 0x37d   :  { %4034 = shalt.err (!%p4031_p3)
}
 0x37e   :  { %3004 = dma.vmem_to_hbm [thread:$0]  %s3002_s8, 128, %s5652_s5, [#allocation4]  }
 0x37f   :  { %4039 = dma.done.wait [#allocation4], 128  }
 0x380   :  { %4040 = vsyncadd [#allocation4], 4294967168 }
 0x381   :  { %3008 = vsyncpa [#allocation3], 1 }
 0x382   :  { %3009 = vsyncpa [#allocation6], 1 }
 0x383   :  { %3010 = vsyncpa [#allocation4], 1 }

</bundles_post_ra>
